<compile_context>
chip_gen: v5e
topology: v5e:2x2
jax: 0.10.0
libtpu: 0.0.40
codegen_flags: <defaults>
</compile_context>

<pallas_src>
import functools
import math

import jax
import jax.numpy as jnp
from jax import lax
from jax.experimental import pallas as pl
from jax.experimental.pallas import tpu as pltpu

LN_EPS = 1e-5


def _layernorm(x, w, b):
    mu = jnp.mean(x, axis=-1, keepdims=True)
    var = jnp.mean((x - mu) ** 2, axis=-1, keepdims=True)
    return (x - mu) * lax.rsqrt(var + LN_EPS) * w + b


# --------------------------------- kernel ---------------------------------
def encoder_stack_kernel(src_ref, pos_ref,
                         wq_ref, bq_ref, wk_ref, bk_ref, wv_ref, bv_ref,
                         wo_ref, bo_ref, ln1w_ref, ln1b_ref,
                         w1_ref, b1_ref, w2_ref, b2_ref,
                         ln2w_ref, ln2b_ref,
                         out_ref, *, nhead, seq_len, pe_only_at_begin):
    """One grid step = (batch block, layer).  Activations (R=bblk*S rows) live
    in the resident output VMEM block across the layer axis."""
    layer = pl.program_id(1)

    # Layer 0: seed the resident activation carry with the input rows.
    @pl.when(layer == 0)
    def _():
        out_ref[...] = src_ref[...]

    R, D = out_ref.shape
    S = seq_len
    bblk = R // S
    hd = D // nhead
    scale = 1.0 / math.sqrt(hd)

    act = out_ref[...].astype(jnp.float32)            # (R, D) carry, f32
    pos = pos_ref[...].astype(jnp.float32)

    if pe_only_at_begin:
        # pos is only added before the first layer (module sets pos=None after).
        gate = jnp.where(layer == 0, 1.0, 0.0)
        qk_in = act + pos * gate
    else:
        qk_in = act + pos

    qk_bf = qk_in.astype(jnp.bfloat16)
    src_bf = act.astype(jnp.bfloat16)

    # QKV projections: pre-transposed (D, D) bf16 weights, big (R, D) matmuls.
    q = jnp.dot(qk_bf, wq_ref[...], preferred_element_type=jnp.float32) + bq_ref[...]
    k = jnp.dot(qk_bf, wk_ref[...], preferred_element_type=jnp.float32) + bk_ref[...]
    v = jnp.dot(src_bf, wv_ref[...], preferred_element_type=jnp.float32) + bv_ref[...]

    q_bf = (q * scale).astype(jnp.bfloat16)
    k_bf = k.astype(jnp.bfloat16)
    v_bf = v.astype(jnp.bfloat16)
    wo_t = wo_ref[...]                                 # (D, D) bf16, pre-transposed

    # Multi-head attention per batch element inside the block.  The output
    # projection is folded per head (head_out @ wo_t[head rows]) and
    # accumulated in f32 -> no lane-dim concat of sub-128-wide head outputs.
    row_blocks = []
    for b in range(bblk):                              # static unroll
        r0 = b * S
        acc = jnp.zeros((S, D), jnp.float32)
        for h in range(nhead):                         # static unroll
            c0 = h * hd
            qh = q_bf[r0:r0 + S, c0:c0 + hd]
            kh = k_bf[r0:r0 + S, c0:c0 + hd]
            vh = v_bf[r0:r0 + S, c0:c0 + hd]
            s = lax.dot_general(qh, kh,                # q @ k^T, no explicit transpose op
                                dimension_numbers=(((1,), (1,)), ((), ())),
                                preferred_element_type=jnp.float32)       # (S, S)
            s = s - jnp.max(s, axis=-1, keepdims=True)
            p = jnp.exp(s)
            p = p * pl.reciprocal(jnp.sum(p, axis=-1, keepdims=True), approx=True)
            hout = jnp.dot(p.astype(jnp.bfloat16), vh,
                           preferred_element_type=jnp.float32)            # (S, hd)
            acc = acc + jnp.dot(hout.astype(jnp.bfloat16), wo_t[c0:c0 + hd, :],
                                preferred_element_type=jnp.float32)       # (S, D)
        row_blocks.append(acc)
    attn = row_blocks[0] if bblk == 1 else jnp.concatenate(row_blocks, axis=0)
    attn = attn + bo_ref[...]

    # Residual + LayerNorm (post-norm), f32.
    x = _layernorm(act + attn, ln1w_ref[...], ln1b_ref[...])

    # FFN (bf16 MXU, f32 accum/bias) + residual + LayerNorm.
    h1 = jnp.dot(x.astype(jnp.bfloat16), w1_ref[...],
                 preferred_element_type=jnp.float32) + b1_ref[...]
    h1 = jnp.maximum(h1, 0.0)
    h2 = jnp.dot(h1.astype(jnp.bfloat16), w2_ref[...],
                 preferred_element_type=jnp.float32) + b2_ref[...]

    y = _layernorm(x + h2, ln2w_ref[...], ln2b_ref[...])
    out_ref[...] = y.astype(out_ref.dtype)


# --------------------------------- wrapper ---------------------------------
def _pick_bblk(B, S):
    """Batch elements per grid step: enough rows to feed the MXU, but keep >=2
    steps on the parallel batch axis (v7x megacore) and 8-aligned row blocks."""
    valid = [d for d in range(1, B + 1)
             if B % d == 0 and ((d * S) % 8 == 0 or d == B)]
    pref = [d for d in valid if d * S <= 256 and (B // d >= 2 or B == 1)]
    return max(pref) if pref else min(valid)


def _stack_layer_params(layer_params):
    """Pre-split/pre-transpose to (in, out) layout, bf16 matmul weights,
    stacked over a leading layer axis."""
    D = layer_params[0]["wo"].shape[0]

    def stack(fn):
        return jnp.stack([fn(p) for p in layer_params], axis=0)

    return dict(
        wq_t=stack(lambda p: p["wqkv"][:D].T.astype(jnp.bfloat16)),
        wk_t=stack(lambda p: p["wqkv"][D:2 * D].T.astype(jnp.bfloat16)),
        wv_t=stack(lambda p: p["wqkv"][2 * D:].T.astype(jnp.bfloat16)),
        bq=stack(lambda p: p["bqkv"][:, :D]),
        bk=stack(lambda p: p["bqkv"][:, D:2 * D]),
        bv=stack(lambda p: p["bqkv"][:, 2 * D:]),
        wo_t=stack(lambda p: p["wo"].T.astype(jnp.bfloat16)),
        bo=stack(lambda p: p["bo"]),
        ln1w=stack(lambda p: p["ln1w"]),
        ln1b=stack(lambda p: p["ln1b"]),
        w1_t=stack(lambda p: p["w1"].T.astype(jnp.bfloat16)),
        b1=stack(lambda p: p["b1"]),
        w2_t=stack(lambda p: p["w2"].T.astype(jnp.bfloat16)),
        b2=stack(lambda p: p["b2"]),
        ln2w=stack(lambda p: p["ln2w"]),
        ln2b=stack(lambda p: p["ln2b"]),
    )


def transformer_encoder_forward(src_sbd, pos_sbd, layer_params, nhead,
                                pe_only_at_begin=False):
    """Mirrors TransformerEncoder.forward (mask=None, norm=None,
    return_atten_map=False).  Inputs are (S, B, D) like the PyTorch module."""
    src = jnp.transpose(src_sbd, (1, 0, 2))            # (B, S, D)
    pos = jnp.transpose(pos_sbd, (1, 0, 2))
    B, S, D = src.shape
    L = len(layer_params)
    FF = layer_params[0]["w1"].shape[0]
    params = _stack_layer_params(layer_params)

    bblk = _pick_bblk(B, S)
    nb = B // bblk
    R = bblk * S

    src2 = src.reshape(B * S, D)
    pos2 = pos.reshape(B * S, D)

    kernel = functools.partial(encoder_stack_kernel, nhead=nhead, seq_len=S,
                               pe_only_at_begin=pe_only_at_begin)

    def act_spec():
        return pl.BlockSpec((R, D), lambda b, l: (b, 0))

    def w_spec(*shape):
        zeros = (0,) * len(shape)
        # Leading layer dim is squeezed; weights stream per layer.
        return pl.BlockSpec((None,) + shape, lambda b, l: (l,) + zeros)

    out2 = pl.pallas_call(
        kernel,
        out_shape=jax.ShapeDtypeStruct((B * S, D), src.dtype),
        grid=(nb, L),
        in_specs=[act_spec(), act_spec(),
                  w_spec(D, D), w_spec(1, D),          # wq_t, bq
                  w_spec(D, D), w_spec(1, D),          # wk_t, bk
                  w_spec(D, D), w_spec(1, D),          # wv_t, bv
                  w_spec(D, D), w_spec(1, D),          # wo_t, bo
                  w_spec(1, D), w_spec(1, D),          # ln1w, ln1b
                  w_spec(D, FF), w_spec(1, FF),        # w1_t, b1
                  w_spec(FF, D), w_spec(1, D),         # w2_t, b2
                  w_spec(1, D), w_spec(1, D)],         # ln2w, ln2b
        out_specs=pl.BlockSpec((R, D), lambda b, l: (b, 0)),
        compiler_params=pltpu.CompilerParams(
            dimension_semantics=("parallel", "arbitrary")),
    )(src2, pos2,
      params["wq_t"], params["bq"], params["wk_t"], params["bk"],
      params["wv_t"], params["bv"], params["wo_t"], params["bo"],
      params["ln1w"], params["ln1b"], params["w1_t"], params["b1"],
      params["w2_t"], params["b2"], params["ln2w"], params["ln2b"])

    return jnp.transpose(out2.reshape(B, S, D), (1, 0, 2))   # back to (S, B, D)


# ------------------------- parameter init (deterministic) -------------------------
def init_layer_params(key, d_model, nhead, dim_ff):
    ks = jax.random.split(key, 4)

    def xavier(k, shape):  # nn.init.xavier_uniform_ for dim > 1 params
        fan_out, fan_in = shape
        a = math.sqrt(6.0 / (fan_in + fan_out))
        return jax.random.uniform(k, shape, jnp.float32, -a, a)

    return dict(
        wqkv=xavier(ks[0], (3 * d_model, d_model)),
        bqkv=jnp.zeros((1, 3 * d_model), jnp.float32),
        wo=xavier(ks[1], (d_model, d_model)),
        bo=jnp.zeros((1, d_model), jnp.float32),
        ln1w=jnp.ones((1, d_model), jnp.float32),
        ln1b=jnp.zeros((1, d_model), jnp.float32),
        w1=xavier(ks[2], (dim_ff, d_model)),
        b1=jnp.zeros((1, dim_ff), jnp.float32),
        w2=xavier(ks[3], (d_model, dim_ff)),
        b2=jnp.zeros((1, d_model), jnp.float32),
        ln2w=jnp.ones((1, d_model), jnp.float32),
        ln2b=jnp.zeros((1, d_model), jnp.float32),
    )


# ------------------------- pure-JAX reference (same precision policy) -------------------------
def _bf16_dot(a, b):
    return jnp.dot(a.astype(jnp.bfloat16), b.astype(jnp.bfloat16),
                   preferred_element_type=jnp.float32)


def _ref_layer(src, pos, p, nhead):
    B, S, D = src.shape
    hd = D // nhead
    wqkv, bqkv = p["wqkv"], p["bqkv"][0]
    qk_in = src + pos
    q = _bf16_dot(qk_in, wqkv[:D].T) + bqkv[:D]
    k = _bf16_dot(qk_in, wqkv[D:2 * D].T) + bqkv[D:2 * D]
    v = _bf16_dot(src, wqkv[2 * D:].T) + bqkv[2 * D:]
    q = (q / math.sqrt(hd)).reshape(B, S, nhead, hd).transpose(0, 2, 1, 3)
    k = k.reshape(B, S, nhead, hd).transpose(0, 2, 1, 3)
    v = v.reshape(B, S, nhead, hd).transpose(0, 2, 1, 3)
    s = jnp.einsum("bhqd,bhkd->bhqk", q.astype(jnp.bfloat16), k.astype(jnp.bfloat16),
                   preferred_element_type=jnp.float32)
    a = jax.nn.softmax(s, axis=-1)
    o = jnp.einsum("bhqk,bhkd->bhqd", a.astype(jnp.bfloat16), v.astype(jnp.bfloat16),
                   preferred_element_type=jnp.float32)
    o = o.transpose(0, 2, 1, 3).reshape(B, S, D)
    att = _bf16_dot(o, p["wo"].T) + p["bo"][0]
    x = _layernorm(src + att, p["ln1w"][0], p["ln1b"][0])
    h = jnp.maximum(_bf16_dot(x, p["w1"].T) + p["b1"][0], 0.0)
    h = _bf16_dot(h, p["w2"].T) + p["b2"][0]
    return _layernorm(x + h, p["ln2w"][0], p["ln2b"][0])


def reference_forward(src_sbd, pos_sbd, layer_params, nhead):
    out = jnp.transpose(src_sbd, (1, 0, 2))
    pos = jnp.transpose(pos_sbd, (1, 0, 2))
    for p in layer_params:
        out = _ref_layer(out, pos, p, nhead)
    return jnp.transpose(out, (1, 0, 2))


if __name__ == "__main__":
    S, B, D, NHEAD, FF, NUM_LAYERS = 8, 4, 32, 4, 64, 2

    key = jax.random.PRNGKey(0)
    k_src, k_pos, k_par = jax.random.split(key, 3)
    src = jax.random.normal(k_src, (S, B, D), jnp.float32)   # (seq, batch, d_model)
    pos = jax.random.normal(k_pos, (S, B, D), jnp.float32)
    layer_params = [init_layer_params(k, D, NHEAD, FF)
                    for k in jax.random.split(k_par, NUM_LAYERS)]

    out = transformer_encoder_forward(src, pos, layer_params, NHEAD)
    out = jax.block_until_ready(out)

    ref = reference_forward(src, pos, layer_params, NHEAD)
    assert out.shape == (S, B, D)
    max_err = float(jnp.max(jnp.abs(out - ref)))
    assert jnp.allclose(out, ref, atol=2e-2, rtol=2e-2), \
        f"mismatch vs JAX reference (max abs err {max_err:.4e})"
    print("KERNEL_OK")
</pallas_src>

<mosaic_0001>
module attributes {stable_mosaic.version = 11 : i64} {
  func.func @encoder_stack_kernel(%arg0: i32, %arg1: i32, %arg2: memref<16x32xf32, #tpu.memory_space<vmem>>, %arg3: memref<16x32xf32, #tpu.memory_space<vmem>>, %arg4: memref<1x32x32xbf16, #tpu.memory_space<vmem>>, %arg5: memref<1x1x32xf32, #tpu.memory_space<vmem>>, %arg6: memref<1x32x32xbf16, #tpu.memory_space<vmem>>, %arg7: memref<1x1x32xf32, #tpu.memory_space<vmem>>, %arg8: memref<1x32x32xbf16, #tpu.memory_space<vmem>>, %arg9: memref<1x1x32xf32, #tpu.memory_space<vmem>>, %arg10: memref<1x32x32xbf16, #tpu.memory_space<vmem>>, %arg11: memref<1x1x32xf32, #tpu.memory_space<vmem>>, %arg12: memref<1x1x32xf32, #tpu.memory_space<vmem>>, %arg13: memref<1x1x32xf32, #tpu.memory_space<vmem>>, %arg14: memref<1x32x64xbf16, #tpu.memory_space<vmem>>, %arg15: memref<1x1x64xf32, #tpu.memory_space<vmem>>, %arg16: memref<1x64x32xbf16, #tpu.memory_space<vmem>>, %arg17: memref<1x1x32xf32, #tpu.memory_space<vmem>>, %arg18: memref<1x1x32xf32, #tpu.memory_space<vmem>>, %arg19: memref<1x1x32xf32, #tpu.memory_space<vmem>>, %arg20: memref<16x32xf32, #tpu.memory_space<vmem>>) attributes {dimension_semantics = [#tpu.dimension_semantics<parallel>, #tpu.dimension_semantics<arbitrary>], iteration_bounds = array<i64: 2, 2>, scalar_prefetch = 0 : i64, scratch_operands = 0 : i64, tpu.core_type = #tpu.core_type<tc>, window_params = [{transform_indices = @transform_0, window_bounds = array<i64: 16, 32>}, {transform_indices = @transform_1, window_bounds = array<i64: 16, 32>}, {transform_indices = @transform_2, window_bounds = array<i64: 1, 32, 32>}, {transform_indices = @transform_3, window_bounds = array<i64: 1, 1, 32>}, {transform_indices = @transform_4, window_bounds = array<i64: 1, 32, 32>}, {transform_indices = @transform_5, window_bounds = array<i64: 1, 1, 32>}, {transform_indices = @transform_6, window_bounds = array<i64: 1, 32, 32>}, {transform_indices = @transform_7, window_bounds = array<i64: 1, 1, 32>}, {transform_indices = @transform_8, window_bounds = array<i64: 1, 32, 32>}, {transform_indices = @transform_9, window_bounds = array<i64: 1, 1, 32>}, {transform_indices = @transform_10, window_bounds = array<i64: 1, 1, 32>}, {transform_indices = @transform_11, window_bounds = array<i64: 1, 1, 32>}, {transform_indices = @transform_12, window_bounds = array<i64: 1, 32, 64>}, {transform_indices = @transform_13, window_bounds = array<i64: 1, 1, 64>}, {transform_indices = @transform_14, window_bounds = array<i64: 1, 64, 32>}, {transform_indices = @transform_15, window_bounds = array<i64: 1, 1, 32>}, {transform_indices = @transform_16, window_bounds = array<i64: 1, 1, 32>}, {transform_indices = @transform_17, window_bounds = array<i64: 1, 1, 32>}, {transform_indices = @transform_18, window_bounds = array<i64: 16, 32>}]} {
    %c0_i32 = arith.constant 0 : i32
    %0 = arith.cmpi eq, %arg1, %c0_i32 : i32
    %1 = arith.extui %0 : i1 to i32
    %c0_i32_0 = arith.constant 0 : i32
    %2 = arith.cmpi ne, %1, %c0_i32_0 : i32
    scf.if %2 {
      %c0_112 = arith.constant 0 : index
      %c0_113 = arith.constant 0 : index
      %276 = vector.load %arg2[%c0_112, %c0_113] : memref<16x32xf32, #tpu.memory_space<vmem>>, vector<16x32xf32>
      %c0_114 = arith.constant 0 : index
      %c0_115 = arith.constant 0 : index
      %277 = vector.load %arg20[%c0_114, %c0_115] : memref<16x32xf32, #tpu.memory_space<vmem>>, vector<16x32xf32>
      tpu.vector_store %arg20[%c0_114, %c0_115], %276 {strides = array<i32>} : memref<16x32xf32, #tpu.memory_space<vmem>>, vector<16x32xf32>,
    } else {
    }
    %c0 = arith.constant 0 : index
    %c0_1 = arith.constant 0 : index
    %3 = vector.load %arg20[%c0, %c0_1] : memref<16x32xf32, #tpu.memory_space<vmem>>, vector<16x32xf32>
    %c0_2 = arith.constant 0 : index
    %c0_3 = arith.constant 0 : index
    %4 = vector.load %arg3[%c0_2, %c0_3] : memref<16x32xf32, #tpu.memory_space<vmem>>, vector<16x32xf32>
    %5 = arith.addf %3, %4 : vector<16x32xf32>
    %6 = arith.truncf %5 : vector<16x32xf32> to vector<16x32xbf16>
    %7 = arith.truncf %3 : vector<16x32xf32> to vector<16x32xbf16>
    %c0_4 = arith.constant 0 : index
    %c0_5 = arith.constant 0 : index
    %c0_6 = arith.constant 0 : index
    %8 = vector.load %arg4[%c0_4, %c0_5, %c0_6] : memref<1x32x32xbf16, #tpu.memory_space<vmem>>, vector<1x32x32xbf16>
    %9 = vector.shape_cast %8 : vector<1x32x32xbf16> to vector<32x32xbf16>
    %cst = arith.constant dense<0.000000e+00> : vector<16x32xf32>
    %10 = tpu.matmul %6, %9, %cst {dimension_numbers = #tpu.dot_dimension_numbers<[1], [0], [0], [1], [0, 0, 1, 1], [], []>} : vector<16x32xbf16>, vector<32x32xbf16>, vector<16x32xf32> -> vector<16x32xf32>
    %c0_7 = arith.constant 0 : index
    %c0_8 = arith.constant 0 : index
    %c0_9 = arith.constant 0 : index
    %11 = vector.load %arg5[%c0_7, %c0_8, %c0_9] : memref<1x1x32xf32, #tpu.memory_space<vmem>>, vector<1x1x32xf32>
    %12 = vector.shape_cast %11 : vector<1x1x32xf32> to vector<1x32xf32>
    %13 = vector.broadcast %12 : vector<1x32xf32> to vector<16x32xf32>
    %14 = arith.addf %10, %13 : vector<16x32xf32>
    %c0_10 = arith.constant 0 : index
    %c0_11 = arith.constant 0 : index
    %c0_12 = arith.constant 0 : index
    %15 = vector.load %arg6[%c0_10, %c0_11, %c0_12] : memref<1x32x32xbf16, #tpu.memory_space<vmem>>, vector<1x32x32xbf16>
    %16 = vector.shape_cast %15 : vector<1x32x32xbf16> to vector<32x32xbf16>
    %cst_13 = arith.constant dense<0.000000e+00> : vector<16x32xf32>
    %17 = tpu.matmul %6, %16, %cst_13 {dimension_numbers = #tpu.dot_dimension_numbers<[1], [0], [0], [1], [0, 0, 1, 1], [], []>} : vector<16x32xbf16>, vector<32x32xbf16>, vector<16x32xf32> -> vector<16x32xf32>
    %c0_14 = arith.constant 0 : index
    %c0_15 = arith.constant 0 : index
    %c0_16 = arith.constant 0 : index
    %18 = vector.load %arg7[%c0_14, %c0_15, %c0_16] : memref<1x1x32xf32, #tpu.memory_space<vmem>>, vector<1x1x32xf32>
    %19 = vector.shape_cast %18 : vector<1x1x32xf32> to vector<1x32xf32>
    %20 = vector.broadcast %19 : vector<1x32xf32> to vector<16x32xf32>
    %21 = arith.addf %17, %20 : vector<16x32xf32>
    %c0_17 = arith.constant 0 : index
    %c0_18 = arith.constant 0 : index
    %c0_19 = arith.constant 0 : index
    %22 = vector.load %arg8[%c0_17, %c0_18, %c0_19] : memref<1x32x32xbf16, #tpu.memory_space<vmem>>, vector<1x32x32xbf16>
    %23 = vector.shape_cast %22 : vector<1x32x32xbf16> to vector<32x32xbf16>
    %cst_20 = arith.constant dense<0.000000e+00> : vector<16x32xf32>
    %24 = tpu.matmul %7, %23, %cst_20 {dimension_numbers = #tpu.dot_dimension_numbers<[1], [0], [0], [1], [0, 0, 1, 1], [], []>} : vector<16x32xbf16>, vector<32x32xbf16>, vector<16x32xf32> -> vector<16x32xf32>
    %c0_21 = arith.constant 0 : index
    %c0_22 = arith.constant 0 : index
    %c0_23 = arith.constant 0 : index
    %25 = vector.load %arg9[%c0_21, %c0_22, %c0_23] : memref<1x1x32xf32, #tpu.memory_space<vmem>>, vector<1x1x32xf32>
    %26 = vector.shape_cast %25 : vector<1x1x32xf32> to vector<1x32xf32>
    %27 = vector.broadcast %26 : vector<1x32xf32> to vector<16x32xf32>
    %28 = arith.addf %24, %27 : vector<16x32xf32>
    %cst_24 = arith.constant 0.353553385 : f32
    %29 = vector.broadcast %cst_24 : f32 to vector<16x32xf32>
    %30 = arith.mulf %14, %29 : vector<16x32xf32>
    %31 = arith.truncf %30 : vector<16x32xf32> to vector<16x32xbf16>
    %32 = arith.truncf %21 : vector<16x32xf32> to vector<16x32xbf16>
    %33 = arith.truncf %28 : vector<16x32xf32> to vector<16x32xbf16>
    %c0_25 = arith.constant 0 : index
    %c0_26 = arith.constant 0 : index
    %c0_27 = arith.constant 0 : index
    %34 = vector.load %arg10[%c0_25, %c0_26, %c0_27] : memref<1x32x32xbf16, #tpu.memory_space<vmem>>, vector<1x32x32xbf16>
    %35 = vector.shape_cast %34 : vector<1x32x32xbf16> to vector<32x32xbf16>
    %cst_28 = arith.constant 0.000000e+00 : f32
    %36 = vector.broadcast %cst_28 : f32 to vector<8x32xf32>
    %37 = vector.extract_strided_slice %31 {offsets = [0, 0], sizes = [8, 8], strides = [1, 1]} : vector<16x32xbf16> to vector<8x8xbf16>
    %38 = vector.extract_strided_slice %32 {offsets = [0, 0], sizes = [8, 8], strides = [1, 1]} : vector<16x32xbf16> to vector<8x8xbf16>
    %39 = vector.extract_strided_slice %33 {offsets = [0, 0], sizes = [8, 8], strides = [1, 1]} : vector<16x32xbf16> to vector<8x8xbf16>
    %cst_29 = arith.constant dense<0.000000e+00> : vector<8x8xf32>
    %40 = tpu.matmul %37, %38, %cst_29 {dimension_numbers = #tpu.dot_dimension_numbers<[1], [1], [0], [0], [0, 0, 1, 0], [], []>} : vector<8x8xbf16>, vector<8x8xbf16>, vector<8x8xf32> -> vector<8x8xf32>
    %cst_30 = arith.constant dense<0xFF800000> : vector<8xf32>
    %41 = vector.multi_reduction <maximumf>, %40, %cst_30 [1] : vector<8x8xf32> to vector<8xf32>
    %42 = vector.shape_cast %41 : vector<8xf32> to vector<8x1xf32>
    %43 = vector.broadcast %42 : vector<8x1xf32> to vector<8x8xf32>
    %44 = arith.subf %40, %43 : vector<8x8xf32>
    %45 = math.exp %44 : vector<8x8xf32>
    %cst_31 = arith.constant dense<0.000000e+00> : vector<8xf32>
    %46 = vector.multi_reduction <add>, %45, %cst_31 [1] : vector<8x8xf32> to vector<8xf32>
    %47 = vector.shape_cast %46 : vector<8xf32> to vector<8x1xf32>
    %48 = tpu.reciprocal %47 {approx = true} : vector<8x1xf32> -> vector<8x1xf32>
    %49 = vector.broadcast %48 : vector<8x1xf32> to vector<8x8xf32>
    %50 = arith.mulf %45, %49 : vector<8x8xf32>
    %51 = arith.truncf %50 : vector<8x8xf32> to vector<8x8xbf16>
    %cst_32 = arith.constant dense<0.000000e+00> : vector<8x8xf32>
    %52 = tpu.matmul %51, %39, %cst_32 {dimension_numbers = #tpu.dot_dimension_numbers<[1], [0], [0], [1], [0, 0, 1, 1], [], []>} : vector<8x8xbf16>, vector<8x8xbf16>, vector<8x8xf32> -> vector<8x8xf32>
    %53 = arith.truncf %52 : vector<8x8xf32> to vector<8x8xbf16>
    %54 = vector.extract_strided_slice %35 {offsets = [0, 0], sizes = [8, 32], strides = [1, 1]} : vector<32x32xbf16> to vector<8x32xbf16>
    %cst_33 = arith.constant dense<0.000000e+00> : vector<8x32xf32>
    %55 = tpu.matmul %53, %54, %cst_33 {dimension_numbers = #tpu.dot_dimension_numbers<[1], [0], [0], [1], [0, 0, 1, 1], [], []>} : vector<8x8xbf16>, vector<8x32xbf16>, vector<8x32xf32> -> vector<8x32xf32>
    %56 = arith.addf %36, %55 : vector<8x32xf32>
    %57 = vector.extract_strided_slice %31 {offsets = [0, 8], sizes = [8, 8], strides = [1, 1]} : vector<16x32xbf16> to vector<8x8xbf16>
    %58 = vector.extract_strided_slice %32 {offsets = [0, 8], sizes = [8, 8], strides = [1, 1]} : vector<16x32xbf16> to vector<8x8xbf16>
    %59 = vector.extract_strided_slice %33 {offsets = [0, 8], sizes = [8, 8], strides = [1, 1]} : vector<16x32xbf16> to vector<8x8xbf16>
    %cst_34 = arith.constant dense<0.000000e+00> : vector<8x8xf32>
    %60 = tpu.matmul %57, %58, %cst_34 {dimension_numbers = #tpu.dot_dimension_numbers<[1], [1], [0], [0], [0, 0, 1, 0], [], []>} : vector<8x8xbf16>, vector<8x8xbf16>, vector<8x8xf32> -> vector<8x8xf32>
    %cst_35 = arith.constant dense<0xFF800000> : vector<8xf32>
    %61 = vector.multi_reduction <maximumf>, %60, %cst_35 [1] : vector<8x8xf32> to vector<8xf32>
    %62 = vector.shape_cast %61 : vector<8xf32> to vector<8x1xf32>
    %63 = vector.broadcast %62 : vector<8x1xf32> to vector<8x8xf32>
    %64 = arith.subf %60, %63 : vector<8x8xf32>
    %65 = math.exp %64 : vector<8x8xf32>
    %cst_36 = arith.constant dense<0.000000e+00> : vector<8xf32>
    %66 = vector.multi_reduction <add>, %65, %cst_36 [1] : vector<8x8xf32> to vector<8xf32>
    %67 = vector.shape_cast %66 : vector<8xf32> to vector<8x1xf32>
    %68 = tpu.reciprocal %67 {approx = true} : vector<8x1xf32> -> vector<8x1xf32>
    %69 = vector.broadcast %68 : vector<8x1xf32> to vector<8x8xf32>
    %70 = arith.mulf %65, %69 : vector<8x8xf32>
    %71 = arith.truncf %70 : vector<8x8xf32> to vector<8x8xbf16>
    %cst_37 = arith.constant dense<0.000000e+00> : vector<8x8xf32>
    %72 = tpu.matmul %71, %59, %cst_37 {dimension_numbers = #tpu.dot_dimension_numbers<[1], [0], [0], [1], [0, 0, 1, 1], [], []>} : vector<8x8xbf16>, vector<8x8xbf16>, vector<8x8xf32> -> vector<8x8xf32>
    %73 = arith.truncf %72 : vector<8x8xf32> to vector<8x8xbf16>
    %74 = vector.extract_strided_slice %35 {offsets = [8, 0], sizes = [8, 32], strides = [1, 1]} : vector<32x32xbf16> to vector<8x32xbf16>
    %cst_38 = arith.constant dense<0.000000e+00> : vector<8x32xf32>
    %75 = tpu.matmul %73, %74, %cst_38 {dimension_numbers = #tpu.dot_dimension_numbers<[1], [0], [0], [1], [0, 0, 1, 1], [], []>} : vector<8x8xbf16>, vector<8x32xbf16>, vector<8x32xf32> -> vector<8x32xf32>
    %76 = arith.addf %56, %75 : vector<8x32xf32>
    %77 = vector.extract_strided_slice %31 {offsets = [0, 16], sizes = [8, 8], strides = [1, 1]} : vector<16x32xbf16> to vector<8x8xbf16>
    %78 = vector.extract_strided_slice %32 {offsets = [0, 16], sizes = [8, 8], strides = [1, 1]} : vector<16x32xbf16> to vector<8x8xbf16>
    %79 = vector.extract_strided_slice %33 {offsets = [0, 16], sizes = [8, 8], strides = [1, 1]} : vector<16x32xbf16> to vector<8x8xbf16>
    %cst_39 = arith.constant dense<0.000000e+00> : vector<8x8xf32>
    %80 = tpu.matmul %77, %78, %cst_39 {dimension_numbers = #tpu.dot_dimension_numbers<[1], [1], [0], [0], [0, 0, 1, 0], [], []>} : vector<8x8xbf16>, vector<8x8xbf16>, vector<8x8xf32> -> vector<8x8xf32>
    %cst_40 = arith.constant dense<0xFF800000> : vector<8xf32>
    %81 = vector.multi_reduction <maximumf>, %80, %cst_40 [1] : vector<8x8xf32> to vector<8xf32>
    %82 = vector.shape_cast %81 : vector<8xf32> to vector<8x1xf32>
    %83 = vector.broadcast %82 : vector<8x1xf32> to vector<8x8xf32>
    %84 = arith.subf %80, %83 : vector<8x8xf32>
    %85 = math.exp %84 : vector<8x8xf32>
    %cst_41 = arith.constant dense<0.000000e+00> : vector<8xf32>
    %86 = vector.multi_reduction <add>, %85, %cst_41 [1] : vector<8x8xf32> to vector<8xf32>
    %87 = vector.shape_cast %86 : vector<8xf32> to vector<8x1xf32>
    %88 = tpu.reciprocal %87 {approx = true} : vector<8x1xf32> -> vector<8x1xf32>
    %89 = vector.broadcast %88 : vector<8x1xf32> to vector<8x8xf32>
    %90 = arith.mulf %85, %89 : vector<8x8xf32>
    %91 = arith.truncf %90 : vector<8x8xf32> to vector<8x8xbf16>
    %cst_42 = arith.constant dense<0.000000e+00> : vector<8x8xf32>
    %92 = tpu.matmul %91, %79, %cst_42 {dimension_numbers = #tpu.dot_dimension_numbers<[1], [0], [0], [1], [0, 0, 1, 1], [], []>} : vector<8x8xbf16>, vector<8x8xbf16>, vector<8x8xf32> -> vector<8x8xf32>
    %93 = arith.truncf %92 : vector<8x8xf32> to vector<8x8xbf16>
    %94 = vector.extract_strided_slice %35 {offsets = [16, 0], sizes = [8, 32], strides = [1, 1]} : vector<32x32xbf16> to vector<8x32xbf16>
    %cst_43 = arith.constant dense<0.000000e+00> : vector<8x32xf32>
    %95 = tpu.matmul %93, %94, %cst_43 {dimension_numbers = #tpu.dot_dimension_numbers<[1], [0], [0], [1], [0, 0, 1, 1], [], []>} : vector<8x8xbf16>, vector<8x32xbf16>, vector<8x32xf32> -> vector<8x32xf32>
    %96 = arith.addf %76, %95 : vector<8x32xf32>
    %97 = vector.extract_strided_slice %31 {offsets = [0, 24], sizes = [8, 8], strides = [1, 1]} : vector<16x32xbf16> to vector<8x8xbf16>
    %98 = vector.extract_strided_slice %32 {offsets = [0, 24], sizes = [8, 8], strides = [1, 1]} : vector<16x32xbf16> to vector<8x8xbf16>
    %99 = vector.extract_strided_slice %33 {offsets = [0, 24], sizes = [8, 8], strides = [1, 1]} : vector<16x32xbf16> to vector<8x8xbf16>
    %cst_44 = arith.constant dense<0.000000e+00> : vector<8x8xf32>
    %100 = tpu.matmul %97, %98, %cst_44 {dimension_numbers = #tpu.dot_dimension_numbers<[1], [1], [0], [0], [0, 0, 1, 0], [], []>} : vector<8x8xbf16>, vector<8x8xbf16>, vector<8x8xf32> -> vector<8x8xf32>
    %cst_45 = arith.constant dense<0xFF800000> : vector<8xf32>
    %101 = vector.multi_reduction <maximumf>, %100, %cst_45 [1] : vector<8x8xf32> to vector<8xf32>
    %102 = vector.shape_cast %101 : vector<8xf32> to vector<8x1xf32>
    %103 = vector.broadcast %102 : vector<8x1xf32> to vector<8x8xf32>
    %104 = arith.subf %100, %103 : vector<8x8xf32>
    %105 = math.exp %104 : vector<8x8xf32>
    %cst_46 = arith.constant dense<0.000000e+00> : vector<8xf32>
    %106 = vector.multi_reduction <add>, %105, %cst_46 [1] : vector<8x8xf32> to vector<8xf32>
    %107 = vector.shape_cast %106 : vector<8xf32> to vector<8x1xf32>
    %108 = tpu.reciprocal %107 {approx = true} : vector<8x1xf32> -> vector<8x1xf32>
    %109 = vector.broadcast %108 : vector<8x1xf32> to vector<8x8xf32>
    %110 = arith.mulf %105, %109 : vector<8x8xf32>
    %111 = arith.truncf %110 : vector<8x8xf32> to vector<8x8xbf16>
    %cst_47 = arith.constant dense<0.000000e+00> : vector<8x8xf32>
    %112 = tpu.matmul %111, %99, %cst_47 {dimension_numbers = #tpu.dot_dimension_numbers<[1], [0], [0], [1], [0, 0, 1, 1], [], []>} : vector<8x8xbf16>, vector<8x8xbf16>, vector<8x8xf32> -> vector<8x8xf32>
    %113 = arith.truncf %112 : vector<8x8xf32> to vector<8x8xbf16>
    %114 = vector.extract_strided_slice %35 {offsets = [24, 0], sizes = [8, 32], strides = [1, 1]} : vector<32x32xbf16> to vector<8x32xbf16>
    %cst_48 = arith.constant dense<0.000000e+00> : vector<8x32xf32>
    %115 = tpu.matmul %113, %114, %cst_48 {dimension_numbers = #tpu.dot_dimension_numbers<[1], [0], [0], [1], [0, 0, 1, 1], [], []>} : vector<8x8xbf16>, vector<8x32xbf16>, vector<8x32xf32> -> vector<8x32xf32>
    %116 = arith.addf %96, %115 : vector<8x32xf32>
    %cst_49 = arith.constant 0.000000e+00 : f32
    %117 = vector.broadcast %cst_49 : f32 to vector<8x32xf32>
    %118 = vector.extract_strided_slice %31 {offsets = [8, 0], sizes = [8, 8], strides = [1, 1]} : vector<16x32xbf16> to vector<8x8xbf16>
    %119 = vector.extract_strided_slice %32 {offsets = [8, 0], sizes = [8, 8], strides = [1, 1]} : vector<16x32xbf16> to vector<8x8xbf16>
    %120 = vector.extract_strided_slice %33 {offsets = [8, 0], sizes = [8, 8], strides = [1, 1]} : vector<16x32xbf16> to vector<8x8xbf16>
    %cst_50 = arith.constant dense<0.000000e+00> : vector<8x8xf32>
    %121 = tpu.matmul %118, %119, %cst_50 {dimension_numbers = #tpu.dot_dimension_numbers<[1], [1], [0], [0], [0, 0, 1, 0], [], []>} : vector<8x8xbf16>, vector<8x8xbf16>, vector<8x8xf32> -> vector<8x8xf32>
    %cst_51 = arith.constant dense<0xFF800000> : vector<8xf32>
    %122 = vector.multi_reduction <maximumf>, %121, %cst_51 [1] : vector<8x8xf32> to vector<8xf32>
    %123 = vector.shape_cast %122 : vector<8xf32> to vector<8x1xf32>
    %124 = vector.broadcast %123 : vector<8x1xf32> to vector<8x8xf32>
    %125 = arith.subf %121, %124 : vector<8x8xf32>
    %126 = math.exp %125 : vector<8x8xf32>
    %cst_52 = arith.constant dense<0.000000e+00> : vector<8xf32>
    %127 = vector.multi_reduction <add>, %126, %cst_52 [1] : vector<8x8xf32> to vector<8xf32>
    %128 = vector.shape_cast %127 : vector<8xf32> to vector<8x1xf32>
    %129 = tpu.reciprocal %128 {approx = true} : vector<8x1xf32> -> vector<8x1xf32>
    %130 = vector.broadcast %129 : vector<8x1xf32> to vector<8x8xf32>
    %131 = arith.mulf %126, %130 : vector<8x8xf32>
    %132 = arith.truncf %131 : vector<8x8xf32> to vector<8x8xbf16>
    %cst_53 = arith.constant dense<0.000000e+00> : vector<8x8xf32>
    %133 = tpu.matmul %132, %120, %cst_53 {dimension_numbers = #tpu.dot_dimension_numbers<[1], [0], [0], [1], [0, 0, 1, 1], [], []>} : vector<8x8xbf16>, vector<8x8xbf16>, vector<8x8xf32> -> vector<8x8xf32>
    %134 = arith.truncf %133 : vector<8x8xf32> to vector<8x8xbf16>
    %135 = vector.extract_strided_slice %35 {offsets = [0, 0], sizes = [8, 32], strides = [1, 1]} : vector<32x32xbf16> to vector<8x32xbf16>
    %cst_54 = arith.constant dense<0.000000e+00> : vector<8x32xf32>
    %136 = tpu.matmul %134, %135, %cst_54 {dimension_numbers = #tpu.dot_dimension_numbers<[1], [0], [0], [1], [0, 0, 1, 1], [], []>} : vector<8x8xbf16>, vector<8x32xbf16>, vector<8x32xf32> -> vector<8x32xf32>
    %137 = arith.addf %117, %136 : vector<8x32xf32>
    %138 = vector.extract_strided_slice %31 {offsets = [8, 8], sizes = [8, 8], strides = [1, 1]} : vector<16x32xbf16> to vector<8x8xbf16>
    %139 = vector.extract_strided_slice %32 {offsets = [8, 8], sizes = [8, 8], strides = [1, 1]} : vector<16x32xbf16> to vector<8x8xbf16>
    %140 = vector.extract_strided_slice %33 {offsets = [8, 8], sizes = [8, 8], strides = [1, 1]} : vector<16x32xbf16> to vector<8x8xbf16>
    %cst_55 = arith.constant dense<0.000000e+00> : vector<8x8xf32>
    %141 = tpu.matmul %138, %139, %cst_55 {dimension_numbers = #tpu.dot_dimension_numbers<[1], [1], [0], [0], [0, 0, 1, 0], [], []>} : vector<8x8xbf16>, vector<8x8xbf16>, vector<8x8xf32> -> vector<8x8xf32>
    %cst_56 = arith.constant dense<0xFF800000> : vector<8xf32>
    %142 = vector.multi_reduction <maximumf>, %141, %cst_56 [1] : vector<8x8xf32> to vector<8xf32>
    %143 = vector.shape_cast %142 : vector<8xf32> to vector<8x1xf32>
    %144 = vector.broadcast %143 : vector<8x1xf32> to vector<8x8xf32>
    %145 = arith.subf %141, %144 : vector<8x8xf32>
    %146 = math.exp %145 : vector<8x8xf32>
    %cst_57 = arith.constant dense<0.000000e+00> : vector<8xf32>
    %147 = vector.multi_reduction <add>, %146, %cst_57 [1] : vector<8x8xf32> to vector<8xf32>
    %148 = vector.shape_cast %147 : vector<8xf32> to vector<8x1xf32>
    %149 = tpu.reciprocal %148 {approx = true} : vector<8x1xf32> -> vector<8x1xf32>
    %150 = vector.broadcast %149 : vector<8x1xf32> to vector<8x8xf32>
    %151 = arith.mulf %146, %150 : vector<8x8xf32>
    %152 = arith.truncf %151 : vector<8x8xf32> to vector<8x8xbf16>
    %cst_58 = arith.constant dense<0.000000e+00> : vector<8x8xf32>
    %153 = tpu.matmul %152, %140, %cst_58 {dimension_numbers = #tpu.dot_dimension_numbers<[1], [0], [0], [1], [0, 0, 1, 1], [], []>} : vector<8x8xbf16>, vector<8x8xbf16>, vector<8x8xf32> -> vector<8x8xf32>
    %154 = arith.truncf %153 : vector<8x8xf32> to vector<8x8xbf16>
    %155 = vector.extract_strided_slice %35 {offsets = [8, 0], sizes = [8, 32], strides = [1, 1]} : vector<32x32xbf16> to vector<8x32xbf16>
    %cst_59 = arith.constant dense<0.000000e+00> : vector<8x32xf32>
    %156 = tpu.matmul %154, %155, %cst_59 {dimension_numbers = #tpu.dot_dimension_numbers<[1], [0], [0], [1], [0, 0, 1, 1], [], []>} : vector<8x8xbf16>, vector<8x32xbf16>, vector<8x32xf32> -> vector<8x32xf32>
    %157 = arith.addf %137, %156 : vector<8x32xf32>
    %158 = vector.extract_strided_slice %31 {offsets = [8, 16], sizes = [8, 8], strides = [1, 1]} : vector<16x32xbf16> to vector<8x8xbf16>
    %159 = vector.extract_strided_slice %32 {offsets = [8, 16], sizes = [8, 8], strides = [1, 1]} : vector<16x32xbf16> to vector<8x8xbf16>
    %160 = vector.extract_strided_slice %33 {offsets = [8, 16], sizes = [8, 8], strides = [1, 1]} : vector<16x32xbf16> to vector<8x8xbf16>
    %cst_60 = arith.constant dense<0.000000e+00> : vector<8x8xf32>
    %161 = tpu.matmul %158, %159, %cst_60 {dimension_numbers = #tpu.dot_dimension_numbers<[1], [1], [0], [0], [0, 0, 1, 0], [], []>} : vector<8x8xbf16>, vector<8x8xbf16>, vector<8x8xf32> -> vector<8x8xf32>
    %cst_61 = arith.constant dense<0xFF800000> : vector<8xf32>
    %162 = vector.multi_reduction <maximumf>, %161, %cst_61 [1] : vector<8x8xf32> to vector<8xf32>
    %163 = vector.shape_cast %162 : vector<8xf32> to vector<8x1xf32>
    %164 = vector.broadcast %163 : vector<8x1xf32> to vector<8x8xf32>
    %165 = arith.subf %161, %164 : vector<8x8xf32>
    %166 = math.exp %165 : vector<8x8xf32>
    %cst_62 = arith.constant dense<0.000000e+00> : vector<8xf32>
    %167 = vector.multi_reduction <add>, %166, %cst_62 [1] : vector<8x8xf32> to vector<8xf32>
    %168 = vector.shape_cast %167 : vector<8xf32> to vector<8x1xf32>
    %169 = tpu.reciprocal %168 {approx = true} : vector<8x1xf32> -> vector<8x1xf32>
    %170 = vector.broadcast %169 : vector<8x1xf32> to vector<8x8xf32>
    %171 = arith.mulf %166, %170 : vector<8x8xf32>
    %172 = arith.truncf %171 : vector<8x8xf32> to vector<8x8xbf16>
    %cst_63 = arith.constant dense<0.000000e+00> : vector<8x8xf32>
    %173 = tpu.matmul %172, %160, %cst_63 {dimension_numbers = #tpu.dot_dimension_numbers<[1], [0], [0], [1], [0, 0, 1, 1], [], []>} : vector<8x8xbf16>, vector<8x8xbf16>, vector<8x8xf32> -> vector<8x8xf32>
    %174 = arith.truncf %173 : vector<8x8xf32> to vector<8x8xbf16>
    %175 = vector.extract_strided_slice %35 {offsets = [16, 0], sizes = [8, 32], strides = [1, 1]} : vector<32x32xbf16> to vector<8x32xbf16>
    %cst_64 = arith.constant dense<0.000000e+00> : vector<8x32xf32>
    %176 = tpu.matmul %174, %175, %cst_64 {dimension_numbers = #tpu.dot_dimension_numbers<[1], [0], [0], [1], [0, 0, 1, 1], [], []>} : vector<8x8xbf16>, vector<8x32xbf16>, vector<8x32xf32> -> vector<8x32xf32>
    %177 = arith.addf %157, %176 : vector<8x32xf32>
    %178 = vector.extract_strided_slice %31 {offsets = [8, 24], sizes = [8, 8], strides = [1, 1]} : vector<16x32xbf16> to vector<8x8xbf16>
    %179 = vector.extract_strided_slice %32 {offsets = [8, 24], sizes = [8, 8], strides = [1, 1]} : vector<16x32xbf16> to vector<8x8xbf16>
    %180 = vector.extract_strided_slice %33 {offsets = [8, 24], sizes = [8, 8], strides = [1, 1]} : vector<16x32xbf16> to vector<8x8xbf16>
    %cst_65 = arith.constant dense<0.000000e+00> : vector<8x8xf32>
    %181 = tpu.matmul %178, %179, %cst_65 {dimension_numbers = #tpu.dot_dimension_numbers<[1], [1], [0], [0], [0, 0, 1, 0], [], []>} : vector<8x8xbf16>, vector<8x8xbf16>, vector<8x8xf32> -> vector<8x8xf32>
    %cst_66 = arith.constant dense<0xFF800000> : vector<8xf32>
    %182 = vector.multi_reduction <maximumf>, %181, %cst_66 [1] : vector<8x8xf32> to vector<8xf32>
    %183 = vector.shape_cast %182 : vector<8xf32> to vector<8x1xf32>
    %184 = vector.broadcast %183 : vector<8x1xf32> to vector<8x8xf32>
    %185 = arith.subf %181, %184 : vector<8x8xf32>
    %186 = math.exp %185 : vector<8x8xf32>
    %cst_67 = arith.constant dense<0.000000e+00> : vector<8xf32>
    %187 = vector.multi_reduction <add>, %186, %cst_67 [1] : vector<8x8xf32> to vector<8xf32>
    %188 = vector.shape_cast %187 : vector<8xf32> to vector<8x1xf32>
    %189 = tpu.reciprocal %188 {approx = true} : vector<8x1xf32> -> vector<8x1xf32>
    %190 = vector.broadcast %189 : vector<8x1xf32> to vector<8x8xf32>
    %191 = arith.mulf %186, %190 : vector<8x8xf32>
    %192 = arith.truncf %191 : vector<8x8xf32> to vector<8x8xbf16>
    %cst_68 = arith.constant dense<0.000000e+00> : vector<8x8xf32>
    %193 = tpu.matmul %192, %180, %cst_68 {dimension_numbers = #tpu.dot_dimension_numbers<[1], [0], [0], [1], [0, 0, 1, 1], [], []>} : vector<8x8xbf16>, vector<8x8xbf16>, vector<8x8xf32> -> vector<8x8xf32>
    %194 = arith.truncf %193 : vector<8x8xf32> to vector<8x8xbf16>
    %195 = vector.extract_strided_slice %35 {offsets = [24, 0], sizes = [8, 32], strides = [1, 1]} : vector<32x32xbf16> to vector<8x32xbf16>
    %cst_69 = arith.constant dense<0.000000e+00> : vector<8x32xf32>
    %196 = tpu.matmul %194, %195, %cst_69 {dimension_numbers = #tpu.dot_dimension_numbers<[1], [0], [0], [1], [0, 0, 1, 1], [], []>} : vector<8x8xbf16>, vector<8x32xbf16>, vector<8x32xf32> -> vector<8x32xf32>
    %197 = arith.addf %177, %196 : vector<8x32xf32>
    %198 = tpu.concatenate %116, %197 in 0 : vector<8x32xf32>, vector<8x32xf32> -> vector<16x32xf32>
    %c0_70 = arith.constant 0 : index
    %c0_71 = arith.constant 0 : index
    %c0_72 = arith.constant 0 : index
    %199 = vector.load %arg11[%c0_70, %c0_71, %c0_72] : memref<1x1x32xf32, #tpu.memory_space<vmem>>, vector<1x1x32xf32>
    %200 = vector.shape_cast %199 : vector<1x1x32xf32> to vector<1x32xf32>
    %201 = vector.broadcast %200 : vector<1x32xf32> to vector<16x32xf32>
    %202 = arith.addf %198, %201 : vector<16x32xf32>
    %203 = arith.addf %3, %202 : vector<16x32xf32>
    %c0_73 = arith.constant 0 : index
    %c0_74 = arith.constant 0 : index
    %c0_75 = arith.constant 0 : index
    %204 = vector.load %arg12[%c0_73, %c0_74, %c0_75] : memref<1x1x32xf32, #tpu.memory_space<vmem>>, vector<1x1x32xf32>
    %205 = vector.shape_cast %204 : vector<1x1x32xf32> to vector<1x32xf32>
    %c0_76 = arith.constant 0 : index
    %c0_77 = arith.constant 0 : index
    %c0_78 = arith.constant 0 : index
    %206 = vector.load %arg13[%c0_76, %c0_77, %c0_78] : memref<1x1x32xf32, #tpu.memory_space<vmem>>, vector<1x1x32xf32>
    %207 = vector.shape_cast %206 : vector<1x1x32xf32> to vector<1x32xf32>
    %cst_79 = arith.constant dense<0.000000e+00> : vector<16xf32>
    %208 = vector.multi_reduction <add>, %203, %cst_79 [1] : vector<16x32xf32> to vector<16xf32>
    %209 = vector.shape_cast %208 : vector<16xf32> to vector<16x1xf32>
    %cst_80 = arith.constant 3.200000e+01 : f32
    %210 = vector.broadcast %cst_80 : f32 to vector<16x1xf32>
    %211 = arith.divf %209, %210 : vector<16x1xf32>
    %212 = vector.broadcast %211 : vector<16x1xf32> to vector<16x32xf32>
    %213 = arith.subf %203, %212 : vector<16x32xf32>
    %214 = arith.mulf %213, %213 : vector<16x32xf32>
    %cst_81 = arith.constant dense<0.000000e+00> : vector<16xf32>
    %215 = vector.multi_reduction <add>, %214, %cst_81 [1] : vector<16x32xf32> to vector<16xf32>
    %216 = vector.shape_cast %215 : vector<16xf32> to vector<16x1xf32>
    %cst_82 = arith.constant 3.200000e+01 : f32
    %217 = vector.broadcast %cst_82 : f32 to vector<16x1xf32>
    %218 = arith.divf %216, %217 : vector<16x1xf32>
    %219 = vector.broadcast %211 : vector<16x1xf32> to vector<16x32xf32>
    %220 = arith.subf %203, %219 : vector<16x32xf32>
    %cst_83 = arith.constant 9.99999974E-6 : f32
    %221 = vector.broadcast %cst_83 : f32 to vector<16x1xf32>
    %222 = arith.addf %218, %221 : vector<16x1xf32>
    %223 = math.rsqrt %222 : vector<16x1xf32>
    %224 = vector.broadcast %223 : vector<16x1xf32> to vector<16x32xf32>
    %225 = arith.mulf %220, %224 : vector<16x32xf32>
    %226 = vector.broadcast %205 : vector<1x32xf32> to vector<16x32xf32>
    %227 = arith.mulf %225, %226 : vector<16x32xf32>
    %228 = vector.broadcast %207 : vector<1x32xf32> to vector<16x32xf32>
    %229 = arith.addf %227, %228 : vector<16x32xf32>
    %230 = arith.truncf %229 : vector<16x32xf32> to vector<16x32xbf16>
    %c0_84 = arith.constant 0 : index
    %c0_85 = arith.constant 0 : index
    %c0_86 = arith.constant 0 : index
    %231 = vector.load %arg14[%c0_84, %c0_85, %c0_86] : memref<1x32x64xbf16, #tpu.memory_space<vmem>>, vector<1x32x64xbf16>
    %232 = vector.shape_cast %231 : vector<1x32x64xbf16> to vector<32x64xbf16>
    %cst_87 = arith.constant dense<0.000000e+00> : vector<16x64xf32>
    %233 = tpu.matmul %230, %232, %cst_87 {dimension_numbers = #tpu.dot_dimension_numbers<[1], [0], [0], [1], [0, 0, 1, 1], [], []>} : vector<16x32xbf16>, vector<32x64xbf16>, vector<16x64xf32> -> vector<16x64xf32>
    %c0_88 = arith.constant 0 : index
    %c0_89 = arith.constant 0 : index
    %c0_90 = arith.constant 0 : index
    %234 = vector.load %arg15[%c0_88, %c0_89, %c0_90] : memref<1x1x64xf32, #tpu.memory_space<vmem>>, vector<1x1x64xf32>
    %235 = vector.shape_cast %234 : vector<1x1x64xf32> to vector<1x64xf32>
    %236 = vector.broadcast %235 : vector<1x64xf32> to vector<16x64xf32>
    %237 = arith.addf %233, %236 : vector<16x64xf32>
    %cst_91 = arith.constant 0.000000e+00 : f32
    %238 = vector.broadcast %cst_91 : f32 to vector<16x64xf32>
    %239 = arith.maximumf %237, %238 : vector<16x64xf32>
    %240 = arith.truncf %239 : vector<16x64xf32> to vector<16x64xbf16>
    %c0_92 = arith.constant 0 : index
    %c0_93 = arith.constant 0 : index
    %c0_94 = arith.constant 0 : index
    %241 = vector.load %arg16[%c0_92, %c0_93, %c0_94] : memref<1x64x32xbf16, #tpu.memory_space<vmem>>, vector<1x64x32xbf16>
    %242 = vector.shape_cast %241 : vector<1x64x32xbf16> to vector<64x32xbf16>
    %cst_95 = arith.constant dense<0.000000e+00> : vector<16x32xf32>
    %243 = tpu.matmul %240, %242, %cst_95 {dimension_numbers = #tpu.dot_dimension_numbers<[1], [0], [0], [1], [0, 0, 1, 1], [], []>} : vector<16x64xbf16>, vector<64x32xbf16>, vector<16x32xf32> -> vector<16x32xf32>
    %c0_96 = arith.constant 0 : index
    %c0_97 = arith.constant 0 : index
    %c0_98 = arith.constant 0 : index
    %244 = vector.load %arg17[%c0_96, %c0_97, %c0_98] : memref<1x1x32xf32, #tpu.memory_space<vmem>>, vector<1x1x32xf32>
    %245 = vector.shape_cast %244 : vector<1x1x32xf32> to vector<1x32xf32>
    %246 = vector.broadcast %245 : vector<1x32xf32> to vector<16x32xf32>
    %247 = arith.addf %243, %246 : vector<16x32xf32>
    %248 = arith.addf %229, %247 : vector<16x32xf32>
    %c0_99 = arith.constant 0 : index
    %c0_100 = arith.constant 0 : index
    %c0_101 = arith.constant 0 : index
    %249 = vector.load %arg18[%c0_99, %c0_100, %c0_101] : memref<1x1x32xf32, #tpu.memory_space<vmem>>, vector<1x1x32xf32>
    %250 = vector.shape_cast %249 : vector<1x1x32xf32> to vector<1x32xf32>
    %c0_102 = arith.constant 0 : index
    %c0_103 = arith.constant 0 : index
    %c0_104 = arith.constant 0 : index
    %251 = vector.load %arg19[%c0_102, %c0_103, %c0_104] : memref<1x1x32xf32, #tpu.memory_space<vmem>>, vector<1x1x32xf32>
    %252 = vector.shape_cast %251 : vector<1x1x32xf32> to vector<1x32xf32>
    %cst_105 = arith.constant dense<0.000000e+00> : vector<16xf32>
    %253 = vector.multi_reduction <add>, %248, %cst_105 [1] : vector<16x32xf32> to vector<16xf32>
    %254 = vector.shape_cast %253 : vector<16xf32> to vector<16x1xf32>
    %cst_106 = arith.constant 3.200000e+01 : f32
    %255 = vector.broadcast %cst_106 : f32 to vector<16x1xf32>
    %256 = arith.divf %254, %255 : vector<16x1xf32>
    %257 = vector.broadcast %256 : vector<16x1xf32> to vector<16x32xf32>
    %258 = arith.subf %248, %257 : vector<16x32xf32>
    %259 = arith.mulf %258, %258 : vector<16x32xf32>
    %cst_107 = arith.constant dense<0.000000e+00> : vector<16xf32>
    %260 = vector.multi_reduction <add>, %259, %cst_107 [1] : vector<16x32xf32> to vector<16xf32>
    %261 = vector.shape_cast %260 : vector<16xf32> to vector<16x1xf32>
    %cst_108 = arith.constant 3.200000e+01 : f32
    %262 = vector.broadcast %cst_108 : f32 to vector<16x1xf32>
    %263 = arith.divf %261, %262 : vector<16x1xf32>
    %264 = vector.broadcast %256 : vector<16x1xf32> to vector<16x32xf32>
    %265 = arith.subf %248, %264 : vector<16x32xf32>
    %cst_109 = arith.constant 9.99999974E-6 : f32
    %266 = vector.broadcast %cst_109 : f32 to vector<16x1xf32>
    %267 = arith.addf %263, %266 : vector<16x1xf32>
    %268 = math.rsqrt %267 : vector<16x1xf32>
    %269 = vector.broadcast %268 : vector<16x1xf32> to vector<16x32xf32>
    %270 = arith.mulf %265, %269 : vector<16x32xf32>
    %271 = vector.broadcast %250 : vector<1x32xf32> to vector<16x32xf32>
    %272 = arith.mulf %270, %271 : vector<16x32xf32>
    %273 = vector.broadcast %252 : vector<1x32xf32> to vector<16x32xf32>
    %274 = arith.addf %272, %273 : vector<16x32xf32>
    %c0_110 = arith.constant 0 : index
    %c0_111 = arith.constant 0 : index
    %275 = vector.load %arg20[%c0_110, %c0_111] : memref<16x32xf32, #tpu.memory_space<vmem>>, vector<16x32xf32>
    tpu.vector_store %arg20[%c0_110, %c0_111], %274 {strides = array<i32>} : memref<16x32xf32, #tpu.memory_space<vmem>>, vector<16x32xf32>,
    return
  }
  func.func @transform_0(%arg0: i32, %arg1: i32) -> (i32, i32) {
    %c0_i32 = arith.constant 0 : i32
    %c0_i32_0 = arith.constant 0 : i32
    return %arg0, %c0_i32 : i32, i32
  }
  func.func @transform_1(%arg0: i32, %arg1: i32) -> (i32, i32) {
    %c0_i32 = arith.constant 0 : i32
    %c0_i32_0 = arith.constant 0 : i32
    return %arg0, %c0_i32 : i32, i32
  }
  func.func @transform_2(%arg0: i32, %arg1: i32) -> (i32, i32, i32) {
    %c0_i32 = arith.constant 0 : i32
    %c0_i32_0 = arith.constant 0 : i32
    %c0_i32_1 = arith.constant 0 : i32
    return %arg1, %c0_i32, %c0_i32_0 : i32, i32, i32
  }
  func.func @transform_3(%arg0: i32, %arg1: i32) -> (i32, i32, i32) {
    %c0_i32 = arith.constant 0 : i32
    %c0_i32_0 = arith.constant 0 : i32
    %c0_i32_1 = arith.constant 0 : i32
    return %arg1, %c0_i32, %c0_i32_0 : i32, i32, i32
  }
  func.func @transform_4(%arg0: i32, %arg1: i32) -> (i32, i32, i32) {
    %c0_i32 = arith.constant 0 : i32
    %c0_i32_0 = arith.constant 0 : i32
    %c0_i32_1 = arith.constant 0 : i32
    return %arg1, %c0_i32, %c0_i32_0 : i32, i32, i32
  }
  func.func @transform_5(%arg0: i32, %arg1: i32) -> (i32, i32, i32) {
    %c0_i32 = arith.constant 0 : i32
    %c0_i32_0 = arith.constant 0 : i32
    %c0_i32_1 = arith.constant 0 : i32
    return %arg1, %c0_i32, %c0_i32_0 : i32, i32, i32
  }
  func.func @transform_6(%arg0: i32, %arg1: i32) -> (i32, i32, i32) {
    %c0_i32 = arith.constant 0 : i32
    %c0_i32_0 = arith.constant 0 : i32
    %c0_i32_1 = arith.constant 0 : i32
    return %arg1, %c0_i32, %c0_i32_0 : i32, i32, i32
  }
  func.func @transform_7(%arg0: i32, %arg1: i32) -> (i32, i32, i32) {
    %c0_i32 = arith.constant 0 : i32
    %c0_i32_0 = arith.constant 0 : i32
    %c0_i32_1 = arith.constant 0 : i32
    return %arg1, %c0_i32, %c0_i32_0 : i32, i32, i32
  }
  func.func @transform_8(%arg0: i32, %arg1: i32) -> (i32, i32, i32) {
    %c0_i32 = arith.constant 0 : i32
    %c0_i32_0 = arith.constant 0 : i32
    %c0_i32_1 = arith.constant 0 : i32
    return %arg1, %c0_i32, %c0_i32_0 : i32, i32, i32
  }
  func.func @transform_9(%arg0: i32, %arg1: i32) -> (i32, i32, i32) {
    %c0_i32 = arith.constant 0 : i32
    %c0_i32_0 = arith.constant 0 : i32
    %c0_i32_1 = arith.constant 0 : i32
    return %arg1, %c0_i32, %c0_i32_0 : i32, i32, i32
  }
  func.func @transform_10(%arg0: i32, %arg1: i32) -> (i32, i32, i32) {
    %c0_i32 = arith.constant 0 : i32
    %c0_i32_0 = arith.constant 0 : i32
    %c0_i32_1 = arith.constant 0 : i32
    return %arg1, %c0_i32, %c0_i32_0 : i32, i32, i32
  }
  func.func @transform_11(%arg0: i32, %arg1: i32) -> (i32, i32, i32) {
    %c0_i32 = arith.constant 0 : i32
    %c0_i32_0 = arith.constant 0 : i32
    %c0_i32_1 = arith.constant 0 : i32
    return %arg1, %c0_i32, %c0_i32_0 : i32, i32, i32
  }
  func.func @transform_12(%arg0: i32, %arg1: i32) -> (i32, i32, i32) {
    %c0_i32 = arith.constant 0 : i32
    %c0_i32_0 = arith.constant 0 : i32
    %c0_i32_1 = arith.constant 0 : i32
    return %arg1, %c0_i32, %c0_i32_0 : i32, i32, i32
  }
  func.func @transform_13(%arg0: i32, %arg1: i32) -> (i32, i32, i32) {
    %c0_i32 = arith.constant 0 : i32
    %c0_i32_0 = arith.constant 0 : i32
    %c0_i32_1 = arith.constant 0 : i32
    return %arg1, %c0_i32, %c0_i32_0 : i32, i32, i32
  }
  func.func @transform_14(%arg0: i32, %arg1: i32) -> (i32, i32, i32) {
    %c0_i32 = arith.constant 0 : i32
    %c0_i32_0 = arith.constant 0 : i32
    %c0_i32_1 = arith.constant 0 : i32
    return %arg1, %c0_i32, %c0_i32_0 : i32, i32, i32
  }
  func.func @transform_15(%arg0: i32, %arg1: i32) -> (i32, i32, i32) {
    %c0_i32 = arith.constant 0 : i32
    %c0_i32_0 = arith.constant 0 : i32
    %c0_i32_1 = arith.constant 0 : i32
    return %arg1, %c0_i32, %c0_i32_0 : i32, i32, i32
  }
  func.func @transform_16(%arg0: i32, %arg1: i32) -> (i32, i32, i32) {
    %c0_i32 = arith.constant 0 : i32
    %c0_i32_0 = arith.constant 0 : i32
    %c0_i32_1 = arith.constant 0 : i32
    return %arg1, %c0_i32, %c0_i32_0 : i32, i32, i32
  }
  func.func @transform_17(%arg0: i32, %arg1: i32) -> (i32, i32, i32) {
    %c0_i32 = arith.constant 0 : i32
    %c0_i32_0 = arith.constant 0 : i32
    %c0_i32_1 = arith.constant 0 : i32
    return %arg1, %c0_i32, %c0_i32_0 : i32, i32, i32
  }
  func.func @transform_18(%arg0: i32, %arg1: i32) -> (i32, i32) {
    %c0_i32 = arith.constant 0 : i32
    %c0_i32_0 = arith.constant 0 : i32
    return %arg0, %c0_i32 : i32, i32
  }
}

</mosaic_0001>

<bundles_post_ra>
// kernel: tpu_custom_call.1
= control target key start
LH: loop header
LB: loop body
LE: loop exit
PB: predicated region body
PF: predicated region fallthrough
CT: control target
= control target key end

     0   :  { %s3677_s0 = inlined_call_operand.vmem [shape: f32[32,32], index: 0, kind: input, shape index: {}]   ;;  %s3678_s1 = inlined_call_operand.vmem [shape: f32[32,32], index: 1, kind: input, shape index: {}]   ;;  %s3679_s2 = inlined_call_operand.vmem [shape: bf16[2,32,32], index: 2, kind: input, shape index: {}]   ;;  %s3680_s3 = inlined_call_operand.hbm [shape: f32[2,1,32], index: 3, kind: input, shape index: {}]   ;;  %s3681_s4 = inlined_call_operand.hbm [shape: bf16[2,32,32], index: 4, kind: input, shape index: {}]   ;;  %s3682_s5 = inlined_call_operand.vmem [shape: f32[2,1,32], index: 5, kind: input, shape index: {}]   ;;  %s3683_s6 = inlined_call_operand.hbm [shape: bf16[2,32,32], index: 6, kind: input, shape index: {}]   ;;  %s3684_s7 = inlined_call_operand.vmem [shape: f32[2,1,32], index: 7, kind: input, shape index: {}]   ;;  %s3685_s8 = inlined_call_operand.hbm [shape: bf16[2,32,32], index: 8, kind: input, shape index: {}]   ;;  %s3686_s9 = inlined_call_operand.vmem [shape: f32[2,1,32], index: 9, kind: input, shape index: {}]   ;;  %s3687_s10 = inlined_call_operand.vmem [shape: f32[2,1,32], index: 10, kind: input, shape index: {}]   ;;  %s3688_s11 = inlined_call_operand.hbm [shape: f32[2,1,32], index: 11, kind: input, shape index: {}]   ;;  %s3689_s12 = inlined_call_operand.hbm [shape: bf16[2,32,64], index: 12, kind: input, shape index: {}]   ;;  %s3690_s13 = inlined_call_operand.vmem [shape: f32[2,1,64], index: 13, kind: input, shape index: {}]   ;;  %s3691_s14 = inlined_call_operand.vmem [shape: bf16[2,64,32], index: 14, kind: input, shape index: {}]   ;;  %s3692_s15 = inlined_call_operand.vmem [shape: f32[2,1,32], index: 15, kind: input, shape index: {}]   ;;  %s3693_s16 = inlined_call_operand.vmem [shape: f32[2,1,32], index: 16, kind: input, shape index: {}]   ;;  %s3694_s17 = inlined_call_operand.hbm [shape: f32[2,1,32], index: 17, kind: input, shape index: {}]   ;;  %s3695_s18 = inlined_call_operand.hbm [shape: f32[32,32], index: 18, kind: output, shape index: {}]  }
   0x1   :  { %3716 = sst [smem:[#allocation35_spill]] %s3677_s0 }
   0x2   :  { %3717 = sst [smem:[#allocation36_spill]] %s3678_s1 }
   0x3   :  { %3718 = sst [smem:[#allocation37_spill]] %s3679_s2 }
   0x4   :  { %3719 = sst [smem:[#allocation38_spill]] %s3680_s3 }
   0x5   :  { %3720 = sst [smem:[#allocation39_spill]] %s3681_s4 }
   0x6   :  { %3721 = sst [smem:[#allocation40_spill]] %s3682_s5 }
   0x7   :  { %3722 = sst [smem:[#allocation41_spill]] %s3683_s6 }
   0x8   :  { %3723 = sst [smem:[#allocation42_spill]] %s3684_s7 }
   0x9   :  { %3724 = sst [smem:[#allocation43_spill]] %s3685_s8 }
   0xa   :  { %3725 = sst [smem:[#allocation44_spill]] %s3686_s9 }
   0xb   :  { %3726 = sst [smem:[#allocation45_spill]] %s3687_s10 }
   0xc   :  { %3727 = sst [smem:[#allocation46_spill]] %s3688_s11 }
   0xd   :  { %3728 = sst [smem:[#allocation47_spill]] %s3689_s12 }
   0xe   :  { %3729 = sst [smem:[#allocation48_spill]] %s3690_s13 }
   0xf   :  { %3730 = sst [smem:[#allocation49_spill]] %s3691_s14 }
  0x10   :  { %3731 = sst [smem:[#allocation50_spill]] %s3692_s15 }
  0x11   :  { %3732 = sst [smem:[#allocation51_spill]] %s3693_s16 }
  0x12   :  { %3733 = sst [smem:[#allocation52_spill]] %s3694_s17 }
  0x13   :  { %3734 = sst [smem:[#allocation53_spill]] %s3695_s18 }
  0x14   :  { %23 = vsyncpa [#allocation3], 0 }
  0x15   :  { %25 = vsyncpa [#allocation3 + $0x1], 0 }
  0x16   :  { %26 = vsyncpa [#allocation6], 0 }
  0x17   :  { %28 = vsyncpa [#allocation6 + $0x1], 0 }
  0x18   :  { %29 = vsyncpa [#allocation9], 0 }
  0x19   :  { %31 = vsyncpa [#allocation9 + $0x1], 0 }
  0x1a   :  { %32 = vsyncpa [#allocation12], 0 }
  0x1b   :  { %34 = vsyncpa [#allocation12 + $0x1], 0 }
  0x1c   :  { %35 = vsyncpa [#allocation4], 0 }
  0x1d   :  { %37 = vsyncpa [#allocation4 + $0x1], 0  ;;  %s3087_s27 = smov 0   ;;  %s3089_s28 = smov 0  }
  0x1e   :  { %s3091_s29 = smov 0   ;;  %s3093_s30 = smov 0  }
  0x1f   :  { %s3095_s0 = smov 0   ;;  %s3097_s19 = smov 0  }
  0x20   :  { %s3099_s1 = smov 0   ;;  %s3101_s20 = smov 0  }
  0x21   :  { %s3103_s21 = smov 0   ;;  %s3105_s22 = smov 0  }
  0x22   :  { %s3107_s2 = smov 0  }
  0x23 LB: > { %3735 = sst [smem:[#allocation20_spill]] %s2942_s27  ;;  %s3141_s23 = sadd.s32 4294967295, %s2982_s2   ;;  %s2982_s2 = sphi %s3107_s2, %s43_s2   ;;  %s2978_s22 = sphi %s3105_s22, %s3812_s22   ;;  %s2974_s21 = sphi %s3103_s21, %s3811_s21   ;;  %s2970_s20 = sphi %s3101_s20, %s3810_s20   ;;  %s2966_s1 = sphi %s3099_s1, %s3809_s1   ;;  %s2962_s19 = sphi %s3097_s19, %s3808_s19   ;;  %s2958_s0 = sphi %s3095_s0, %s3807_s0   ;;  %s2954_s30 = sphi %s3093_s30, %s3806_s30   ;;  %s2950_s29 = sphi %s3091_s29, %s3805_s29   ;;  %s2946_s28 = sphi %s3089_s28, %s3804_s28   ;;  %s2942_s27 = sphi %s3087_s27, %s3803_s27  }
  0x24   : > { %3736 = sst [smem:[#allocation21_spill]] %s2946_s28  ;;  %s2315_s24 = sadd.s32 4294967294, %s2982_s2  }
  0x25   : > { %3737 = sst [smem:[#allocation22_spill]] %s2950_s29  ;;  %s52_s25 = sadd.s32 1, %s2974_s21 }
  0x26   : > { %3738 = sst [smem:[#allocation23_spill]] %s2958_s0  ;;  %s55_s26 = sadd.s32 1, %s2978_s22 }
  0x27   : > { %3739 = sst [smem:[#allocation24_spill]] %s2962_s19  ;;  %p53_p0 = scmp.ge.s32.totalorder %s52_s25, 2 }
  0x28   : > { %3740 = sst [smem:[#allocation25_spill]] %s2970_s20  ;;  %s140_s18 = sadd.s32 1, %s2962_s19 }
  0x29   : > { %3741 = sst [smem:[#allocation26_spill]] %s2974_s21  ;;  %p147_p1 = scmp.ne.s32.totalorder %s2962_s19, %s2958_s0 }
  0x2a   : > { %3742 = sst [smem:[#allocation27_spill]] %s2978_s22  ;;  %p148_p2 = scmp.eq.s32.totalorder %s2982_s2, 0 }
  0x2b   : > { %3743 = sst [smem:[#allocation28_spill]] %s2982_s2  ;;  %s3814_s25 = smov (%p53_p0, %s52_s25), 0 }
  0x2c   : > { %3744 = sst [smem:[#allocation29_spill]] %s3814_s25  ;;  %s3816_s26 = smov (!%p53_p0, %s55_s26), %s2978_s22 }
  0x2d   : > { %s137_s16 = ssub.s32 %s2974_s21, %s3814_s25  ;;  %p3155_p3 = por %p148_p2, %p147_p1 }
  0x2e   : > { %p57_p4 = scmp.ge.s32.totalorder %s3816_s26, 2  ;;  %p138_p5 = scmp.eq.s32.totalorder %s137_s16, 0 }
  0x2f   : > { %p153_p6 = scmp.ne.s32.totalorder %s2958_s0, %s2954_s30  ;;  %p154_p7 = scmp.eq.s32.totalorder %s3141_s23, 0 }
  0x30   : > { %s3818_s26 = smov (%p57_p4, %s3816_s26), 0  ;;  %s530_s10 = sadd.s32 1, %s2950_s29 }
  0x31   : > { %3746 = sst [smem:[#allocation30_spill]] %s3818_s26  ;;  %p3166_p8 = por %p154_p7, %p153_p6 }
  0x32   : > { %s3164_s14 = scalar_select %p138_p5, %s2962_s19, %s140_s18  }
  0x33   : > { %s527_s13 = ssub.s32 %s2978_s22, %s3818_s26  ;;  %p540_p10 = scmp.ne.s32.totalorder %s2950_s29, %s2946_s28 }
  0x34   : > { %3747 = sst [smem:[#allocation31_spill]] %s3164_s14  ;;  %p528_p9 = scmp.eq.s32.totalorder %s527_s13, 0 }
  0x35   : > { %p541_p11 = scmp.eq.s32.totalorder %s3141_s23, 3  ;;  %p546_p13 = scmp.ne.s32.totalorder %s2946_s28, %s2942_s27 }
  0x36   : > { %s3177_s16 = scalar_select %p528_p9, %s2950_s29, %s530_s10  }
  0x37   : > { %p3179_p12 = por %p541_p11, %p540_p10  ;;  %p547_p0 = scmp.eq.s32.totalorder %s2315_s24, 3 }
  0x38   : > { %3749 = sst [smem:[#allocation32_spill]] %s3177_s16  ;;  %p2488_p1 = scmp.lt.s32.totalorder %s2982_s2, 4 }
  0x39   : > { %s3750_s30 = scalar_select %p3179_p12, 1, 0 }
  0x3a   : > { %s3187_s18 = sand.u32 1, %s2962_s19   ;;  %p3189_p2 = por %p547_p0, %p546_p13 }
  0x3b   : > { %3751 = sst [smem:[#allocation33_spill]] %s3750_s30  ;;  %s3194_s13 = sand.u32 1, %s2982_s2  }
  0x3c   : > { %s3752_s14 = scalar_select %p3189_p2, 1, 0 }
  0x3d   : > { %p3198_p4 = pnand %p2488_p1, %p3155_p3  ;;  %s3203_s24 = sshll.u32 %s3187_s18, 4 }
  0x3e   : > { %3753 = sst [smem:[#allocation34_spill]] %s3752_s14  ;;  %s3206_s26 = sshll.u32 %s2974_s21, 4 }
  0x3f   : > { %s3755_s4 = sld [smem:[#allocation39_spill]]  ;;  %s614_s15 = scalar_lea.vmem [#allocation5], %s3203_s24 }
  0x40   : > { %s622_s29 = sshll.u32 %s614_s15, 4  ;;  %p2330_p3 = scmp.ge.s32.totalorder %s2982_s2, 1  ;;  %s623_s29 = int_to_ptr.vmem [resolvable:$true] %s622_s29 }
  0x41   : > { %s3706_s27 = scalar_lea.sflag [#allocation6], %s3194_s13  ;;  %s2984_s30 = smov 64  }
  0x42   : > { %s2985_s9 = smov 4   ;;  %p780_p5 = scmp.lt.s32.totalorder %s2982_s2, 5 }
  0x43   : > { %s3756_s8 = sld [smem:[#allocation43_spill]]  ;;  %s670_s7 = scalar_lea.vmem [#allocation8], %s3203_s24 }
  0x44   : > { %p3227_p6 = pnand %p2330_p3, %p780_p5  ;;  %s678_s5 = sshll.u32 %s670_s7, 4  ;;  %s679_s5 = int_to_ptr.vmem [resolvable:$true] %s678_s5 }
  0x45   : > { %s619_s16 = scalar_lea.hbm %s3755_s4, %s3206_s26  ;;  %s3758_s12 = sld [smem:[#allocation47_spill]] }
  0x46   : > { %s620_s14 = sshll.u32 %s619_s16, 4  ;;  %s3710_s7 = scalar_lea.sflag [#allocation12], %s3194_s13  ;;  %s621_s14 = int_to_ptr.hbm [resolvable:$true] %s620_s14 }
  0x47   : > { %2468 = dma.hbm_to_vmem [thread:$0]  (!%p3198_p4), %s621_s14, 256, %s623_s29, %s3706_s27, %s2984_s30, %s2984_s30, %s2985_s9  }
  0x48   : > { %s3707_s14 = scalar_lea.sflag [#allocation9], %s3194_s13  ;;  %s721_s27 = scalar_lea.vmem [#allocation11], %s3203_s24 }
  0x49   : > { %s675_s16 = scalar_lea.hbm %s3756_s8, %s3206_s26  ;;  %s729_s8 = sshll.u32 %s721_s27, 4  ;;  %s730_s8 = int_to_ptr.vmem [resolvable:$true] %s729_s8 }
  0x4a   : > { %s676_s4 = sshll.u32 %s675_s16, 4  ;;  %s3759_s3 = sld [smem:[#allocation38_spill]]  ;;  %s677_s4 = int_to_ptr.hbm [resolvable:$true] %s676_s4 }
  0x4b   : > { %2474 = dma.hbm_to_vmem [thread:$0]  (!%p3198_p4), %s677_s4, 256, %s679_s5, %s3707_s14, %s2984_s30, %s2984_s30, %s2985_s9  }
  0x4c   : > { %s726_s22 = scalar_lea.hbm %s3758_s12, %s3206_s26  ;;  %s596_s19 = scalar_lea.vmem [#allocation2], %s3187_s18 }
  0x4d   : > { %s727_s16 = sshll.u32 %s726_s22, 4  ;;  %s603_s22 = sshll.u32 %s596_s19, 4  ;;  %s728_s16 = int_to_ptr.hbm [resolvable:$true] %s727_s16  ;;  %s604_s22 = int_to_ptr.vmem [resolvable:$true] %s603_s22 }
  0x4e   : > { %2480 = dma.hbm_to_vmem [thread:$0]  (!%p3198_p4), %s728_s16, 256, %s730_s8, %s3710_s7, %s2984_s30, %s2984_s30, %s2985_s9  }
  0x4f   : > { %s594_s14 = scalar_lea.sflag [#allocation3], %s3187_s18  ;;  %s3760_s6 = sld [smem:[#allocation41_spill]] }
  0x50   : > { %s599_s29 = scalar_lea.hbm %s3759_s3, %s2974_s21  ;;  %s642_s16 = scalar_lea.vmem [#allocation7], %s3203_s24 }
  0x51   : > { %s601_s27 = sshll.u32 %s599_s29, 4  ;;  %s650_s4 = sshll.u32 %s642_s16, 4  ;;  %s602_s27 = int_to_ptr.hbm [resolvable:$true] %s601_s27  ;;  %s651_s4 = int_to_ptr.vmem [resolvable:$true] %s650_s4 }
  0x52   : > { %2465 = dma.hbm_to_vmem [thread:$0]  (!%p3198_p4), %s602_s27, 16, %s604_s22, %s594_s14  }
  0x53   : > { %s3761_s29 = scalar_lea.sflag [#allocation6], %s3194_s13  ;;  %s3762_s11 = sld [smem:[#allocation46_spill]] }
  0x54   : > { %s703_s12 = scalar_lea.vmem [#allocation10], %s3187_s18  ;;  %s3763_s24 = scalar_lea.sflag [#allocation9], %s3194_s13 }
  0x55   : > { %s647_s8 = scalar_lea.hbm %s3760_s6, %s3206_s26  ;;  %s710_s2 = sshll.u32 %s703_s12, 4  ;;  %s711_s2 = int_to_ptr.vmem [resolvable:$true] %s710_s2 }
  0x56   : > { %s648_s5 = sshll.u32 %s647_s8, 4  ;;  %s3764_s17 = sld [smem:[#allocation52_spill]]  ;;  %s649_s5 = int_to_ptr.hbm [resolvable:$true] %s648_s5 }
  0x57   : > { %2471 = dma.hbm_to_vmem [thread:$0]  (!%p3198_p4), %s649_s5, 256, %s651_s4, %s3761_s29, %s2984_s30, %s2984_s30, %s2985_s9  }
  0x58   : > { %s768_s7 = scalar_lea.vmem [#allocation13], %s3187_s18  ;;  %s3765_s9 = scalar_lea.sflag [#allocation12], %s3194_s13 }
  0x59   : > { %s706_s22 = scalar_lea.hbm %s3762_s11, %s2974_s21  ;;  %s775_s3 = sshll.u32 %s768_s7, 4  ;;  %s776_s3 = int_to_ptr.vmem [resolvable:$true] %s775_s3 }
  0x5a   : > { %s708_s26 = sshll.u32 %s706_s22, 4  ;;  %784 = sbr.rel (%p3227_p6) target bundleno = 2968 (0xb98), region = 92  ;;  %s709_s26 = int_to_ptr.hbm [resolvable:$true] %s708_s26 }
  0x5b   : > { %2477 = dma.hbm_to_vmem [thread:$0]  (!%p3198_p4), %s709_s26, 16, %s711_s2, %s3763_s24  }
  0x5c   : > { %s771_s16 = scalar_lea.hbm %s3764_s17, %s2974_s21  ;;  %s3294_s30 = sand.u32 (!%p3227_p6), 1, %s2958_s0  }
  0x5d   : > { %s773_s6 = sshll.u32 %s771_s16, 4  ;;  %s787_s4 = scalar_lea.sflag (!%p3227_p6), [#allocation3], %s3294_s30  ;;  %s774_s6 = int_to_ptr.hbm [resolvable:$true] %s773_s6 }
  0x5e   : > { %2483 = dma.hbm_to_vmem [thread:$0]  (!%p3198_p4), %s774_s6, 16, %s776_s3, %s3765_s9  }
  0x5f   : > { %2921 = dma.done.wait (%p3166_p8), %s787_s4, 16  }
  0x60   : > { %2923 = vsyncadd (%p3166_p8), %s787_s4, 4294967280  ;;  %s795_s3 = sand.u32 1, %s3141_s23   ;;  %s3304_s6 = sshll.u32 %s3294_s30, 4 }
  0x61   : > { %s796_s18 = scalar_lea.sflag [#allocation6], %s795_s3 }
  0x62   : > { %2925 = dma.done.wait (%p3166_p8), %s796_s18, 512  }
  0x63   : > { %2927 = vsyncadd (%p3166_p8), %s796_s18, 4294966784  ;;  %s816_s15 = scalar_lea.sflag [#allocation9], %s795_s3  ;;  %s3313_s7 = scalar_lea.vmem [#allocation8], %s3304_s6 }
  0x64   : > { %2929 = dma.done.wait (%p3166_p8), %s816_s15, 272  }
  0x65   : > { %2931 = vsyncadd (%p3166_p8), %s816_s15, 4294967024  ;;  %s835_s29 = scalar_lea.sflag [#allocation12], %s795_s3 }
  0x66   : > { %2933 = dma.done.wait (%p3166_p8), %s835_s29, 272  }
  0x67   : > { %2935 = vsyncadd (%p3166_p8), %s835_s29, 4294967024  ;;  %s3711_s14 = sand.u32 1, %s2946_s28   ;;  %s2336_s12 = sshll.u32 %s2970_s20, 1 }
  0x68   : > { %s2335_s22 = sshll.u32 %s3711_s14, 4  ;;  %p970_p7 = scmp.lt.s32.totalorder %s2336_s12, 3 }
  0x69   : > { %p981_p9 = scmp.lt.s32.totalorder %s2966_s1, 1  ;;  %s3766_s27 = sld [smem:[#allocation35_spill]] }
  0x6a   : > { %s3820_s12 = smov (!%p970_p7, %s2336_s12), 3  ;;  %s3767_s4 = sld [smem:[#allocation36_spill]] }
  0x6b   : > { %s3331_s2 = scalar_select %p981_p9, %s2966_s1, 1 }
  0x6c   : > { %s2337_s25 = sshll.u32 %s3820_s12, 3  ;;  %s3769_s5 = sld [smem:[#allocation37_spill]] }
  0x6d   : > { %s2431_s18 = sshll.u32 %s3331_s2, 4  ;;  %s3770_s17 = sld [smem:[#allocation42_spill]] }
  0x6e   : > { %s3772_s9 = sld [smem:[#allocation45_spill]]  ;;  %s2432_s29 = sshll.u32 %s3331_s2, 5 }
  0x6f   : > { %s973_s8 = scalar_lea.vmem %s3766_s27, %s2337_s25  ;;  %s3773_s15 = sld [smem:[#allocation48_spill]] }
  0x70   : > { %s3339_s3 = scalar_lea.vmem %s3767_s4, %s2337_s25  ;;  %s3776_s27 = sld [smem:[#allocation51_spill]] }
  0x71   : > { %s847_s16 = scalar_lea.vmem [#allocation13], %s3294_s30  ;;  %s3380_s25 = scalar_lea.vmem [#allocation14], %s2335_s22 }
  0x72   : > { %s985_s13 = scalar_lea.vmem %s3769_s5, %s2431_s18  ;;  %s3774_s5 = sld [smem:[#allocation49_spill]] }
  0x73   : > { %s991_s21 = scalar_lea.vmem %s3770_s17, %s3331_s2  ;;  %s3775_s18 = sld [smem:[#allocation50_spill]] }
  0x74   : > { %s997_s4 = scalar_lea.vmem %s3772_s9, %s3331_s2  ;;  %p2344_p8 = scmp.ne.s32.totalorder %s2966_s1, 0 }
  0x75   : > { %s1000_s14 = scalar_lea.vmem %s3773_s15, %s3331_s2 }
  0x76   : > { %s1011_s0 = scalar_lea.vmem %s3776_s27, %s3331_s2  ;;  %1017 = sbr.rel (%p2344_p8) target bundleno = 126 (0x7e), region = 124 }
  0x78   : > { %s3369_s19 = scalar_lea.vmem %s3774_s5, %s2432_s29 }
  0x79   : > { %s1008_s12 = scalar_lea.vmem %s3775_s18, %s3331_s2 }
  0x7b   : > { %v1018_v0 = vld [vmem:[%s973_s8] sm:$0xff]  ;;  %vm1020_vm0 = vcmask 261120   ;;  %v1019_v1 = vld [vmem:[%s973_s8 + $0x8] sm:$0xff] }
  0x7c   : > { %1021 = vst.msk [vmem:[%s3380_s25] sm:$0xff] %vm1020_vm0, %v1018_v0 }
  0x7d   : > { %1022 = vst.msk [vmem:[%s3380_s25 + $0x8] sm:$0xff] %vm1020_vm0, %v1019_v1 }
  0x7e PF: > { %v2434_v2 = vld [vmem:[%s985_s13 + $0x8] sm:$0xff]  ;;  %s3777_s28 = scalar_lea.vmem [#allocation5], %s3304_s6  ;;  %v2433_v4 = vld [vmem:[%s985_s13] sm:$0xff]  ;;  %vm1051_vm1 = vcmask 261120   ;;  %s3779_s20 = scalar_lea.vmem [#allocation2], %s3294_s30  ;;  %vm1152_vm2 = vcmask 64512  }
  0x7f   : > { %v2436_v3 = vld [vmem:[%s3777_s28 + $0x8] sm:$0xff]  ;;  %s3778_s1 = smov %s3777_s28  ;;  %1061 = vmatpush.bf16.msra.mxu0 %v2434_v2  ;;  %s3780_s22 = sld [smem:[#allocation40_spill]]  ;;  %vm1187_vm3 = vcmask 1043456   ;;  %vm1908_vm11 = vcmask 523264  }
  0x80   : > { %v2435_v5 = vld [vmem:[%s3778_s1] sm:$0xff]  ;;  %1095 = vmatpush.bf16.msra.mxu1 %v2436_v3  ;;  %v1026_v9 = vld [vmem:[%s3339_s3 + $0x8] sm:$0xff]  ;;  %s2987_s9 = smov 120   ;;  %s3782_s15 = scalar_lea.vmem [#allocation7], %s3304_s6 }
  0x81   : > { %v1025_v8 = vld [vmem:[%s3339_s3] sm:$0xff]  ;;  %s2986_s3 = smov 112   ;;  %s3783_s29 = smov %s3782_s15 }
  0x82   : > { %v3403_v13 = vld [vmem:[%s3779_s20] ss:$0 sm:$0xff]  ;;  %s3785_s18 = sld [smem:[#allocation44_spill]]  ;;  %s3787_s24 = scalar_lea.vmem [#allocation11], %s3304_s6 }
  0x83   : > { %v3390_v6 = vld [vmem:[%s3380_s25] sm:$0xff]  ;;  %1062 = vmatpush.bf16.msra.mxu0 %v2433_v4  ;;  %v3444_v45 = vld [vmem:[%s991_s21] ss:$0 sm:$0xff]  ;;  %s2988_s21 = smov 104   ;;  %s3788_s27 = smov %s3787_s24 }
  0x84   : > { %v3393_v7 = vld [vmem:[%s3380_s25 + $0x8] sm:$0xff]  ;;  %v1027_v10 = vadd.f32 %v1025_v8, %v3390_v6  ;;  %1096 = vmatpush.bf16.msra.mxu1 %v2435_v5  ;;  %s3790_s20 = scalar_lea.vmem [#allocation10], %s3294_s30 }
  0x85   : > { %v1028_v11 = vadd.f32 %v1026_v9, %v3393_v7  ;;  %s3781_s8 = scalar_lea.vmem %s3780_s22, %s3331_s2  ;;  %v2438_v27 = vld [vmem:[%s3782_s15 + $0x8] sm:$0xff]  ;;  %v1030_v33 = vpack.c.bf16 %v3393_v7, %v3390_v6 }
  0x86   : > { %v3410_v14 = vld [vmem:[%s3781_s8] ss:$0 sm:$0xff]  ;;  %1132 = vmatpush.bf16.msra.mxu2 %v2438_v27 }
  0x87   : > { %v1029_v12 = vpack.c.bf16 %v1028_v11, %v1027_v10  ;;  %v2437_v28 = vld [vmem:[%s3783_s29] sm:$0xff]  ;;  %s3795_s29 = sld [smem:[#allocation21_spill]] }
  0x88   : > { %s3786_s26 = scalar_lea.vmem %s3785_s18, %s3331_s2 }
  0x89   : > { %2353 = vmatmul.msk.bf16.vlgmr.msra.gmra.mxu0 %vm1051_vm1, %v1029_v12  ;;  %2362 = vmatmul.msk.bf16.vlgmr.msra.gmra.mxu1 %vm1051_vm1, %v1029_v12 }
  0x8a   : > { %1133 = vmatpush.bf16.msra.mxu2 %v2437_v28 }
  0x8d   : > { %2371 = vmatmul.msk.bf16.vlgmr.msra.gmra.mxu2 %vm1051_vm1, %v1030_v33  ;;  %v1148_v33 = vld [vmem:[%s3313_s7] sm:$0xf] }
 0x106   : > { %v1064_v15 = vpop.f32.mrf.mxu0  ;;  %v1098_v16 = vpop.f32.mrf.mxu1 }
 0x107   : > { %v1065_v17 = vadd.f32 %v3403_v13, %v1064_v15  ;;  %v1099_v18 = vadd.f32 %v3410_v14, %v1098_v16 }
 0x109   : > { %v1140_v19 = vmul.f32 0.35355338, %v1065_v17  ;;  %v1144_v20 = vpack.c.bf16 %v1099_v18, %v1099_v18 }
 0x10b   : > { %v1142_v21 = vpack.c.bf16 %v1140_v19, %v1140_v19  ;;  %v1211_v22 = vunpack.c.l.b16 %v1144_v20  ;;  %v1157_v23 = vsel %vm1152_vm2, %v1144_v20, 0  ;;  %v1149_v20 = vld [vmem:[%s3313_s7 + $0x4] sm:$0xf] }
 0x10c   : > { %1166 = vmatpush.bf16.xpose.msra.mxu3 %v1157_v23 }
 0x10d   : > { %v3415_v24 = vpack.c.b16 %v1211_v22, %v1211_v22  ;;  %v1206_v25 = vunpack.c.l.b16 %v1142_v21 }
 0x10e   : > { %v3435_v38 = vpop.f32.mrf.mxu1  ;;  %v1066_v22 = vpop.f32.mrf.mxu0 }
 0x10f   : > { %1311 = vrot.lane.b32.xlu1 %v3415_v24, %s2986_s3  ;;  %1213 = vrot.lane.b32.xlu0 %v3415_v24, %s2987_s9  ;;  %v1207_v26 = vpack.c.b16 %v1206_v25, %v1206_v25  ;;  %v1067_v23 = vadd.f32 %v3403_v13, %v1066_v22  ;;  %v1101_v27 = vadd.f32 %v3410_v14, %v3435_v38  ;;  %v1150_v13 = vld [vmem:[%s3313_s7 + $0x8] sm:$0xf] }
 0x110   : > { %v1135_v46 = vpop.f32.mrf.mxu2 }
 0x111   : > { %v1136_v47 = vadd.f32 %v3444_v45, %v1135_v46  ;;  %v1145_v28 = vpack.c.bf16 %v1101_v27, %v1101_v27 }
 0x113   : > { %2372 = vmatmul.msk.bf16.vlgmr.msra.gmra.mxu3 %vm1152_vm2, %v1142_v21  ;;  %v1146_v48 = vpack.c.bf16 %v1136_v47, %v1136_v47  ;;  %v1275_v21 = vsel %vm1187_vm3, %v1149_v20, 0 }
 0x114   : > { %1284 = vmatpush.bf16.msrb.mxu3 %v1275_v21 }
 0x115   : > { %v1247_v49 = vunpack.c.l.b16 %v1146_v48  ;;  %v1189_v51 = vsel %vm1187_vm3, %v1146_v48, 0 }
 0x116   : > { %1198 = vmatpush.bf16.msrb.mxu0 %v1189_v51 }
 0x117   : > { %1309 = vrot.lane.b32.xlu1 %v1207_v26, %s2986_s3  ;;  %1208 = vrot.lane.b32.xlu0 %v1207_v26, %s2987_s9  ;;  %v1248_v50 = vpack.c.b16 %v1247_v49, %v1247_v49 }
 0x118   : > { %v1137_v14 = vpop.f32.mrf.mxu2 }
 0x11f   : > { %1249 = vrot.lane.b32.xlu1 %v1248_v50, %s2987_s9 }
 0x127   : > { %1344 = vrot.lane.b32.xlu1 %v1248_v50, %s2986_s3 }
 0x181   : > { %v1312_v29 = vpop.permute.xlu1 %1311  ;;  %v1214_v30 = vpop.permute.xlu0 %1213 }
 0x182   : > { %v1317_v31 = vsel %vm1152_vm2, %v1312_v29, 0  ;;  %v1219_v32 = vsel %vm1152_vm2, %v1214_v30, 0  ;;  %v1520_v30 = vunpack.c.l.b16 %v1145_v28 }
 0x183   : > { %1228 = vmatpush.bf16.xpose.msrb.mxu1 %v1219_v32  ;;  %v1370_v32 = vsel %vm1187_vm3, %v1150_v13, 0 }
 0x184   : > { %1379 = vmatpush.bf16.msra.mxu3 %v1370_v32 }
 0x189   : > { %v1209_v34 = vpop.permute.xlu0 %1208  ;;  %v1310_v36 = vpop.permute.xlu1 %1309 }
 0x18a   : > { %2374 = vmatmul.msk.bf16.vlgmr.msrb.gmra.mxu1 %vm1152_vm2, %v1209_v34  ;;  %v1294_v34 = vsel %vm1187_vm3, %v1148_v33, 0 }
 0x18b   : > { %1326 = vmatpush.bf16.xpose.msra.mxu1 %v1317_v31  ;;  %v3471_v31 = vpack.c.b16 %v1520_v30, %v1520_v30  ;;  %1303 = vmatpush.bf16.msra.mxu0 %v1294_v34 }
 0x191   : > { %v1250_v63 = vpop.permute.xlu1 %1249 }
 0x192   : > { %v1255_v0 = vsel %vm1187_vm3, %v1250_v63, 0 }
 0x193   : > { %1264 = vmatpush.bf16.msrb.mxu2 %v1255_v0 }
 0x196   : > { %v1168_v35 = vpop.f32.mrf.mxu3 }
 0x197   : > { %v1172_v62 = vsel %vm1152_vm2, %v1168_v35, -inf }
 0x199   : > { %v1345_v1 = vpop.permute.xlu1 %1344 }
 0x19a   : > { %2378 = vmatmul.msk.bf16.vlgmr.msra.gmra.mxu1 %vm1152_vm2, %v1310_v36  ;;  %v1350_v2 = vsel %vm1187_vm3, %v1345_v1, 0 }
 0x19b   : > { %1359 = vmatpush.bf16.msra.mxu2 %v1350_v2 }
 0x19e   : > { %v1170_v37 = vpop.f32.mrf.mxu3 }
 0x19f   : > { %v1467_v37 = vsel %vm1152_vm2, %v1145_v28, 0 }
 0x207   : > { %v1230_v39 = vpop.f32.mrf.mxu1 }
 0x208   : > { %v1234_v40 = vsel %vm1152_vm2, %v1230_v39, -inf }
 0x209   : > { %1235 = vmax.xlane.f32.xlu2 %v1234_v40 }
 0x20f   : > { %v1232_v41 = vpop.f32.mrf.mxu1 }
 0x217   : > { %v1328_v42 = vpop.f32.mrf.mxu1 }
 0x218   : > { %v1332_v43 = vsel %vm1152_vm2, %v1328_v42, -inf }
 0x219   : > { %1333 = vmax.xlane.f32.xlu2 %v1332_v43 }
 0x21f   : > { %v1330_v44 = vpop.f32.mrf.mxu1 }
 0x27c   : > { %v1236_v52 = vpop.xlane.xlu2 %1235 }
 0x27d   : > { %v1237_v53 = vsub.f32 %v1230_v39, %v1236_v52  ;;  %v1138_v52 = vadd.f32 %v3444_v45, %v1137_v14 }
 0x27f   : > { %v1238_v54 = vmul.f32 1.442695, %v1237_v53 }
 0x281   : > { %2596 = vpow2.f32 %v1238_v54  ;;  %v3489_v54 = vpack.c.bf16 %v1138_v52, %v1138_v52 }
 0x287   : > { %v2597_v55 = vpop.eup %2596 }
 0x288   : > { %v1240_v56 = vsel %vm1152_vm2, %v2597_v55, 0.0 }
 0x289   : > { %1241 = vadd.xlane.f32.xlu0 %v1240_v56 }
 0x28c   : > { %v1334_v57 = vpop.xlane.xlu2 %1333 }
 0x28d   : > { %v1335_v58 = vsub.f32 %v1328_v42, %v1334_v57  ;;  %v1498_v57 = vsel %vm1187_vm3, %v3489_v54, 0 }
 0x28f   : > { %v1336_v59 = vmul.f32 1.442695, %v1335_v58 }
 0x291   : > { %2598 = vpow2.f32 %v1336_v59 }
 0x297   : > { %v2599_v60 = vpop.eup %2598 }
 0x298   : > { %v1338_v61 = vsel %vm1152_vm2, %v2599_v60, 0.0 }
 0x299   : > { %1339 = vadd.xlane.f32.xlu2 %v1338_v61 }
 0x2a1   : > { %1173 = vmax.xlane.f32.xlu2 %v1172_v62 }
 0x2b9   : > { %1388 = vrot.lane.b32.xlu2 %v3415_v24, %s2988_s21  ;;  %v1141_v24 = vmul.f32 0.35355338, %v1067_v23 }
 0x2bb   : > { %v1143_v25 = vpack.c.bf16 %v1141_v24, %v1141_v24 }
 0x2c1   : > { %1386 = vrot.lane.b32.xlu2 %v1207_v26, %s2988_s21  ;;  %v1515_v26 = vunpack.c.l.b16 %v1143_v25 }
 0x2c3   : > { %v3467_v29 = vpack.c.b16 %v1515_v26, %v1515_v26 }
 0x2fc   : > { %v1242_v3 = vpop.xlane.xlu0 %1241 }
 0x2fd   : > { %2600 = vrcp.f32 %v1242_v3 }
 0x303   : > { %v2601_v4 = vpop.eup %2600 }
 0x304   : > { %v1244_v5 = vmul.f32 %v2601_v4, %v2597_v55 }
 0x306   : > { %v1245_v8 = vpack.c.bf16 %v1244_v5, %v1244_v5 }
 0x308   : > { %2375 = vmatmul.msk.bf16.vlgmr.msrb.gmra.mxu2 %vm1152_vm2, %v1245_v8 }
 0x30c   : > { %v1340_v9 = vpop.xlane.xlu2 %1339 }
 0x30d   : > { %2602 = vrcp.f32 %v1340_v9 }
 0x313   : > { %v2603_v10 = vpop.eup %2602 }
 0x314   : > { %v1342_v11 = vmul.f32 %v2603_v10, %v2599_v60  ;;  %v1174_v12 = vpop.xlane.xlu2 %1173 }
 0x315   : > { %v1175_v15 = vsub.f32 %v1168_v35, %v1174_v12 }
 0x316   : > { %v1343_v16 = vpack.c.bf16 %v1342_v11, %v1342_v11 }
 0x317   : > { %v1176_v17 = vmul.f32 1.442695, %v1175_v15 }
 0x318   : > { %2379 = vmatmul.msk.bf16.vlgmr.msra.gmra.mxu2 %vm1152_vm2, %v1343_v16 }
 0x319   : > { %2604 = vpow2.f32 %v1176_v17 }
 0x31c   : > { %v1389_v44 = vpop.permute.xlu2 %1388 }
 0x31d   : > { %v1394_v47 = vsel %vm1152_vm2, %v1389_v44, 0 }
 0x31f   : > { %v2605_v18 = vpop.eup %2604 }
 0x320   : > { %v1178_v19 = vsel %vm1152_vm2, %v2605_v18, 0.0 }
 0x321   : > { %1179 = vadd.xlane.f32.xlu1 %v1178_v19 }
 0x324   : > { %v1387_v61 = vpop.permute.xlu2 %1386 }
 0x33a   : > { %1421 = vrot.lane.b32.xlu1 %v1248_v50, %s2988_s21 }
 0x342   : > { %1517 = vrot.lane.b32.xlu1 %v3467_v29, %s2987_s9 }
 0x34a   : > { %1688 = vrot.lane.b32.xlu1 %v3471_v31, %s2988_s21 }
 0x38b   : > { %v1266_v35 = vpop.f32.mrf.mxu2 }
 0x38c   : > { %v1270_v36 = vpack.c.bf16 %v1266_v35, %v1266_v35 }
 0x38e   : > { %2376 = vmatmul.msk.bf16.vlgmr.msrb.gmra.mxu3 %vm1152_vm2, %v1270_v36 }
 0x38f   : > { %1476 = vmatpush.bf16.xpose.msrb.mxu3 %v1467_v37  ;;  %v1151_v37 = vld [vmem:[%s3313_s7 + $0xc] sm:$0xf]  ;;  %s3799_s7 = sand.u32 1, %s3795_s29  }
 0x390   : > { %s1987_s17 = scalar_lea.sflag [#allocation4], %s3799_s7 }
 0x393   : > { %v1268_v38 = vpop.f32.mrf.mxu2 }
 0x394   : > { %v1180_v39 = vpop.xlane.xlu1 %1179  ;;  %v3522_v38 = vsel %vm1187_vm3, %v1151_v37, 0 }
 0x395   : > { %2606 = vrcp.f32 %v1180_v39  ;;  %1456 = vmatpush.bf16.msrb.mxu2 %v3522_v38 }
 0x39b   : > { %v2607_v40 = vpop.eup %2606  ;;  %v1361_v41 = vpop.f32.mrf.mxu2 }
 0x39c   : > { %v1182_v42 = vmul.f32 %v2607_v40, %v2605_v18  ;;  %v1365_v43 = vpack.c.bf16 %v1361_v41, %v1361_v41 }
 0x39e   : > { %2380 = vmatmul.msk.bf16.vlgmr.msra.gmra.mxu3 %vm1152_vm2, %v1365_v43  ;;  %v1183_v46 = vpack.c.bf16 %v1182_v42, %v1182_v42 }
 0x39f   : > { %1590 = vmatpush.bf16.msra.mxu3 %v1275_v21 }
 0x3a0   : > { %2373 = vmatmul.msk.bf16.vlgmr.msrb.gmra.mxu0 %vm1152_vm2, %v1183_v46 }
 0x3a1   : > { %1403 = vmatpush.bf16.xpose.msrb.mxu0 %v1394_v47 }
 0x3a3   : > { %v1363_v48 = vpop.f32.mrf.mxu2 }
 0x3ac   : > { %v1422_v49 = vpop.permute.xlu1 %1421 }
 0x3ad   : > { %v1427_v50 = vsel %vm1187_vm3, %v1422_v49, 0 }
 0x3ae   : > { %1436 = vmatpush.bf16.msrb.mxu1 %v1427_v50  ;;  %2384 = vmatmul.msk.bf16.vlgmr.msrb.gmra.mxu3 %vm1152_vm2, %v1143_v25 }
 0x3af   : > { %1679 = vmatpush.bf16.msrb.mxu3 %v1370_v32 }
 0x3b4   : > { %v1518_v17 = vpop.permute.xlu1 %1517 }
 0x3bc   : > { %v1689_v23 = vpop.permute.xlu1 %1688 }
 0x3bd   : > { %v1694_v25 = vsel %vm1152_vm2, %v1689_v23, 0 }
 0x411   : > { %v3486_v51 = vpop.f32.mrf.mxu3 }
 0x419   : > { %v1288_v53 = vpop.f32.mrf.mxu3 }
 0x41d   : > { %v1200_v55 = vpop.f32.mrf.mxu0 }
 0x41e   : > { %v1204_v56 = vpack.c.bf16 %v1200_v55, %v1200_v55 }
 0x420   : > { %2377 = vmatmul.msk.bf16.vlgmr.msra.gmra.mxu0 %vm1152_vm2, %v1204_v56  ;;  %v1556_v56 = vunpack.c.l.b16 %v3489_v54 }
 0x421   : > { %1507 = vmatpush.bf16.msra.mxu0 %v1498_v57  ;;  %v3494_v58 = vpop.f32.mrf.mxu3 }
 0x422   : > { %v1557_v57 = vpack.c.b16 %v1556_v56, %v1556_v56 }
 0x425   : > { %v1202_v59 = vpop.f32.mrf.mxu0 }
 0x429   : > { %v1383_v60 = vpop.f32.mrf.mxu3 }
 0x430   : > { %2381 = vmatmul.msk.bf16.vlgmr.msrb.gmra.mxu0 %vm1152_vm2, %v1387_v61 }
 0x431   : > { %v1478_v62 = vpop.f32.mrf.mxu3  ;;  %1606 = vmatpush.bf16.msrb.mxu0 %v1294_v34 }
 0x432   : > { %v1482_v45 = vsel %vm1152_vm2, %v1478_v62, -inf }
 0x433   : > { %1483 = vmax.xlane.f32.xlu0 %v1482_v45 }
 0x439   : > { %v1480_v63 = vpop.f32.mrf.mxu3 }
 0x49d   : > { %v3498_v0 = vpop.f32.mrf.mxu0 }
 0x4a5   : > { %v1307_v1 = vpop.f32.mrf.mxu0 }
 0x4a6   : > { %v1484_v2 = vpop.xlane.xlu0 %1483 }
 0x4a7   : > { %v1485_v3 = vsub.f32 %v1478_v62, %v1484_v2 }
 0x4a9   : > { %v1486_v4 = vmul.f32 1.442695, %v1485_v3 }
 0x4ab   : > { %2608 = vpow2.f32 %v1486_v4 }
 0x4ad   : > { %v1405_v5 = vpop.f32.mrf.mxu0 }
 0x4ae   : > { %v1409_v8 = vsel %vm1152_vm2, %v1405_v5, -inf }
 0x4af   : > { %1410 = vmax.xlane.f32.xlu0 %v1409_v8 }
 0x4b1   : > { %v2609_v9 = vpop.eup %2608 }
 0x4b2   : > { %v1488_v10 = vsel %vm1152_vm2, %v2609_v9, 0.0 }
 0x4b3   : > { %1489 = vadd.xlane.f32.xlu2 %v1488_v10 }
 0x4b5   : > { %v1407_v11 = vpop.f32.mrf.mxu0 }
 0x4cb   : > { %1612 = vrot.lane.b32.xlu2 %v3467_v29, %s2986_s3 }
 0x522   : > { %v1411_v12 = vpop.xlane.xlu0 %1410 }
 0x523   : > { %v1412_v15 = vsub.f32 %v1405_v5, %v1411_v12 }
 0x525   : > { %v1413_v16 = vmul.f32 1.442695, %v1412_v15 }
 0x526   : > { %v1490_v18 = vpop.xlane.xlu2 %1489 }
 0x527   : > { %2610 = vpow2.f32 %v1413_v16  ;;  %v3545_v16 = vld [vmem:[%s3786_s26] ss:$0 sm:$0xff] }
 0x528   : > { %2612 = vrcp.f32 %v1490_v18 }
 0x52d   : > { %v2611_v19 = vpop.eup %2610 }
 0x52e   : > { %v2613_v20 = vpop.eup %2612  ;;  %v1415_v21 = vsel %vm1152_vm2, %v2611_v19, 0.0  ;;  %v1613_v36 = vpop.permute.xlu2 %1612 }
 0x52f   : > { %v1492_v22 = vmul.f32 %v2613_v20, %v2609_v9  ;;  %1416 = vadd.xlane.f32.xlu0 %v1415_v21  ;;  %v1306_v9 = vadd.f32 %v3498_v0, %v3486_v51 }
 0x531   : > { %v1493_v24 = vpack.c.bf16 %v1492_v22, %v1492_v22  ;;  %v1385_v12 = vadd.f32 %v3494_v58, %v1306_v9 }
 0x533   : > { %2385 = vmatmul.msk.bf16.vlgmr.msra.gmra.mxu0 %vm1152_vm2, %v1493_v24 }
 0x534   : > { %1703 = vmatpush.bf16.xpose.msra.mxu0 %v1694_v25 }
 0x543   : > { %1522 = vrot.lane.b32.xlu0 %v3471_v31, %s2987_s9 }
 0x54b   : > { %1614 = vrot.lane.b32.xlu0 %v3471_v31, %s2986_s3 }
 0x553   : > { %1686 = vrot.lane.b32.xlu0 %v3467_v29, %s2988_s21 }
 0x5a2   : > { %v1417_v26 = vpop.xlane.xlu0 %1416 }
 0x5a3   : > { %2614 = vrcp.f32 %v1417_v26  ;;  %v2989_v26 = vmov 32.0  }
 0x5a9   : > { %v2615_v27 = vpop.eup %2614 }
 0x5aa   : > { %v1419_v28 = vmul.f32 %v2615_v27, %v2611_v19 }
 0x5ac   : > { %v1420_v30 = vpack.c.bf16 %v1419_v28, %v1419_v28 }
 0x5ae   : > { %2382 = vmatmul.msk.bf16.vlgmr.msrb.gmra.mxu1 %vm1152_vm2, %v1420_v30 }
 0x5b0   : > { %v1509_v13 = vpop.f32.mrf.mxu0 }
 0x5b1   : > { %v1513_v32 = vpack.c.bf16 %v1509_v13, %v1509_v13 }
 0x5b3   : > { %2389 = vmatmul.msk.bf16.vlgmr.msrb.gmra.mxu0 %vm1152_vm2, %v1513_v32 }
 0x5b5   : > { %v1523_v33 = vpop.permute.xlu0 %1522 }
 0x5b6   : > { %v1528_v34 = vsel %vm1152_vm2, %v1523_v33, 0 }
 0x5b7   : > { %1537 = vmatpush.bf16.xpose.msra.mxu1 %v1528_v34 }
 0x5b8   : > { %v1511_v31 = vpop.f32.mrf.mxu0 }
 0x5bd   : > { %v1615_v14 = vpop.permute.xlu0 %1614 }
 0x5be   : > { %v1620_v29 = vsel %vm1152_vm2, %v1615_v14, 0  ;;  %2386 = vmatmul.msk.bf16.vlgmr.msra.gmra.mxu1 %vm1152_vm2, %v1518_v17 }
 0x5bf   : > { %1629 = vmatpush.bf16.xpose.msrb.mxu1 %v1620_v29 }
 0x5c5   : > { %v1687_v35 = vpop.permute.xlu0 %1686 }
 0x5c6   : > { %2393 = vmatmul.msk.bf16.vlgmr.msra.gmra.mxu0 %vm1152_vm2, %v1687_v35 }
 0x5ce   : > { %2390 = vmatmul.msk.bf16.vlgmr.msrb.gmra.mxu1 %vm1152_vm2, %v1613_v36 }
 0x62b   : > { %v1438_v39 = vpop.f32.mrf.mxu1 }
 0x62c   : > { %v1442_v40 = vpack.c.bf16 %v1438_v39, %v1438_v39 }
 0x62e   : > { %2383 = vmatmul.msk.bf16.vlgmr.msrb.gmra.mxu2 %vm1152_vm2, %v1442_v40 }
 0x630   : > { %v3526_v41 = vpop.f32.mrf.mxu0 }
 0x633   : > { %v1440_v42 = vpop.f32.mrf.mxu1 }
 0x638   : > { %v1610_v43 = vpop.f32.mrf.mxu0 }
 0x63b   : > { %v1539_v44 = vpop.f32.mrf.mxu1 }
 0x63c   : > { %v1543_v46 = vsel %vm1152_vm2, %v1539_v44, -inf }
 0x63d   : > { %1544 = vmax.xlane.f32.xlu1 %v1543_v46 }
 0x643   : > { %v1541_v47 = vpop.f32.mrf.mxu1  ;;  %v1705_v48 = vpop.f32.mrf.mxu0 }
 0x644   : > { %v1709_v49 = vsel %vm1152_vm2, %v1705_v48, -inf }
 0x645   : > { %1710 = vmax.xlane.f32.xlu2 %v1709_v49 }
 0x64b   : > { %v1631_v50 = vpop.f32.mrf.mxu1  ;;  %v1707_v52 = vpop.f32.mrf.mxu0 }
 0x64c   : > { %v1635_v53 = vsel %vm1152_vm2, %v1631_v50, -inf }
 0x64d   : > { %1636 = vmax.xlane.f32.xlu0 %v1635_v53 }
 0x653   : > { %v1633_v55 = vpop.f32.mrf.mxu1 }
 0x65d   : > { %1647 = vrot.lane.b32.xlu2 %v1557_v57, %s2986_s3 }
 0x661   : > { %1558 = vrot.lane.b32.xlu0 %v1557_v57, %s2987_s9 }
 0x669   : > { %1721 = vrot.lane.b32.xlu0 %v1557_v57, %s2988_s21 }
 0x6b0   : > { %v1545_v59 = vpop.xlane.xlu1 %1544 }
 0x6b1   : > { %v1546_v60 = vsub.f32 %v1539_v44, %v1545_v59  ;;  %v1458_v61 = vpop.f32.mrf.mxu2 }
 0x6b2   : > { %v1462_v15 = vadd.f32 %v1458_v61, %v1385_v12 }
 0x6b3   : > { %v1547_v62 = vmul.f32 1.442695, %v1546_v60 }
 0x6b4   : > { %v1764_v20 = vadd.f32 %v3545_v16, %v1462_v15 }
 0x6b5   : > { %2616 = vpow2.f32 %v1547_v62 }
 0x6b6   : > { %v1766_v58 = vadd.f32 %v1764_v20, %v3390_v6 }
 0x6b8   : > { %v1711_v2 = vpop.xlane.xlu2 %1710  ;;  %v1770_v24 = vsel %vm1051_vm1, %v1766_v58, 0.0 }
 0x6b9   : > { %v1460_v45 = vpop.f32.mrf.mxu2  ;;  %v1712_v4 = vsub.f32 %v1705_v48, %v1711_v2 }
 0x6bb   : > { %v2617_v63 = vpop.eup %2616  ;;  %v1713_v8 = vmul.f32 1.442695, %v1712_v4 }
 0x6bc   : > { %v1549_v1 = vsel %vm1152_vm2, %v2617_v63, 0.0 }
 0x6bd   : > { %1550 = vadd.xlane.f32.xlu1 %v1549_v1 }
 0x6c0   : > { %v1637_v54 = vpop.xlane.xlu0 %1636  ;;  %v1648_v18 = vpop.permute.xlu2 %1647 }
 0x6c1   : > { %v1638_v3 = vsub.f32 %v1631_v50, %v1637_v54  ;;  %v1653_v21 = vsel %vm1187_vm3, %v1648_v18, 0 }
 0x6c3   : > { %v1639_v5 = vmul.f32 1.442695, %v1638_v3 }
 0x6c5   : > { %2618 = vpow2.f32 %v1639_v5 }
 0x6c6   : > { %2620 = vpow2.f32 %v1713_v8 }
 0x6cb   : > { %v2619_v10 = vpop.eup %2618 }
 0x6cc   : > { %v1641_v11 = vsel %vm1152_vm2, %v2619_v10, 0.0  ;;  %v2621_v17 = vpop.eup %2620 }
 0x6cd   : > { %1642 = vadd.xlane.f32.xlu1 %v1641_v11  ;;  %v1715_v0 = vsel %vm1152_vm2, %v2621_v17, 0.0 }
 0x6d3   : > { %v1559_v19 = vpop.permute.xlu0 %1558 }
 0x6d4   : > { %v1564_v51 = vsel %vm1187_vm3, %v1559_v19, 0  ;;  %v2439_v19 = vld [vmem:[%s3788_s27] sm:$0xff] }
 0x6d5   : > { %1716 = vadd.xlane.f32.xlu1 %v1715_v0  ;;  %1573 = vmatpush.bf16.msra.mxu2 %v1564_v51 }
 0x6d9   : > { %1662 = vmatpush.bf16.msrb.mxu2 %v1653_v21 }
 0x6db   : > { %v1722_v22 = vpop.permute.xlu0 %1721 }
 0x6dc   : > { %v1727_v23 = vsel %vm1187_vm3, %v1722_v22, 0 }
 0x6dd   : > { %1771 = vadd.xlane.f32.xlu1 %v1770_v24  ;;  %1736 = vmatpush.bf16.msra.mxu1 %v1727_v23 }
 0x730   : > { %v1551_v25 = vpop.xlane.xlu1 %1550 }
 0x731   : > { %2622 = vrcp.f32 %v1551_v25 }
 0x732   : > { %2624 = vrcp.f32 %v2989_v26 }
 0x737   : > { %v2623_v27 = vpop.eup %2622 }
 0x738   : > { %v1553_v28 = vmul.f32 %v2623_v27, %v2617_v63  ;;  %v2625_v13 = vpop.eup %2624 }
 0x739   : > { %v1777_v6 = vmul.f32 32.0, %v2625_v13  ;;  %vm1781_vm4 = vweird.f32 %v2625_v13 }
 0x73a   : > { %v1554_v30 = vpack.c.bf16 %v1553_v28, %v1553_v28 }
 0x73b   : > { %v1778_v33 = vsub.f32 1.0, %v1777_v6  ;;  %v2590_v6 = vld [vmem:[%s997_s4] ss:$0 sm:$0xff] }
 0x73c   : > { %2387 = vmatmul.msk.bf16.vlgmr.msra.gmra.mxu2 %vm1152_vm2, %v1554_v30 }
 0x73d   : > { %1753 = vmatpush.bf16.msra.mxu2 %v3522_v38  ;;  %v1779_v34 = vmul.f32 %v2625_v13, %v1778_v33 }
 0x73f   : > { %v1780_v36 = vadd.f32 %v2625_v13, %v1779_v34 }
 0x740   : > { %v1643_v32 = vpop.xlane.xlu1 %1642 }
 0x741   : > { %2626 = vrcp.f32 %v1643_v32  ;;  %v3557_v37 = vsel %vm1781_vm4, %v2625_v13, %v1780_v36 }
 0x747   : > { %v2627_v31 = vpop.eup %2626 }
 0x748   : > { %v1645_v14 = vmul.f32 %v2627_v31, %v2619_v10  ;;  %v1717_v29 = vpop.xlane.xlu1 %1716  ;;  %v2591_v31 = vld [vmem:[%s3790_s20] ss:$0 sm:$0xff] }
 0x749   : > { %2628 = vrcp.f32 %v1717_v29 }
 0x74a   : > { %v1646_v35 = vpack.c.bf16 %v1645_v14, %v1645_v14 }
 0x74c   : > { %2391 = vmatmul.msk.bf16.vlgmr.msrb.gmra.mxu2 %vm1152_vm2, %v1646_v35 }
 0x74f   : > { %v2629_v39 = vpop.eup %2628 }
 0x750   : > { %v1719_v40 = vmul.f32 %v2629_v39, %v2621_v17  ;;  %v1772_v42 = vpop.xlane.xlu1 %1771 }
 0x751   : > { %v1783_v38 = vmul.f32 %v3557_v37, %v1772_v42  ;;  %v2444_v42 = vld [vmem:[%s3369_s19 + $0x18] sm:$0xff] }
 0x752   : > { %v1720_v43 = vpack.c.bf16 %v1719_v40, %v1719_v40  ;;  %1916 = vmatpush.bf16.msrb.mxu0 %v2444_v42 }
 0x753   : > { %v3560_v44 = vsub.f32 %v1766_v58, %v1783_v38  ;;  %v2443_v38 = vld [vmem:[%s3369_s19 + $0x10] sm:$0xff] }
 0x754   : > { %2394 = vmatmul.msk.bf16.vlgmr.msra.gmra.mxu1 %vm1152_vm2, %v1720_v43  ;;  %v2442_v43 = vld [vmem:[%s3369_s19 + $0x8] sm:$0xff] }
 0x755   : > { %v1787_v46 = vmul.f32 %v3560_v44, %v3560_v44 }
 0x756   : > { %1917 = vmatpush.bf16.msrb.mxu0 %v2443_v38 }
 0x757   : > { %v1789_v47 = vsel %vm1051_vm1, %v1787_v46, 0.0 }
 0x758   : > { %1790 = vadd.xlane.f32.xlu1 %v1789_v47  ;;  %v2592_v47 = vld [vmem:[%s1000_s14] ss:$0 sm:$0xff]  ;;  %s3793_s14 = sld [smem:[#allocation25_spill]] }
 0x75a   : > { %1918 = vmatpush.bf16.msrb.mxu0 %v2442_v43 }
 0x75e   : > { %s2445_s15 = sshll.u32 %s3793_s14, 4 }
 0x7bf   : > { %v1575_v48 = vpop.f32.mrf.mxu2 }
 0x7c0   : > { %v1579_v49 = vpack.c.bf16 %v1575_v48, %v1575_v48 }
 0x7c2   : > { %2388 = vmatmul.msk.bf16.vlgmr.msra.gmra.mxu3 %vm1152_vm2, %v1579_v49 }
 0x7c7   : > { %v1577_v50 = vpop.f32.mrf.mxu2 }
 0x7cb   : > { %v1791_v15 = vpop.xlane.xlu1 %1790 }
 0x7cf   : > { %v1664_v52 = vpop.f32.mrf.mxu2 }
 0x7d0   : > { %v1668_v53 = vpack.c.bf16 %v1664_v52, %v1664_v52 }
 0x7d1   : > { %v1738_v55 = vpop.f32.mrf.mxu1 }
 0x7d2   : > { %v1742_v56 = vpack.c.bf16 %v1738_v55, %v1738_v55  ;;  %2392 = vmatmul.msk.bf16.vlgmr.msrb.gmra.mxu3 %vm1152_vm2, %v1668_v53 }
 0x7d4   : > { %2395 = vmatmul.msk.bf16.vlgmr.msra.gmra.mxu2 %vm1152_vm2, %v1742_v56  ;;  %v2593_v56 = vld [vmem:[%s1008_s12] ss:$0 sm:$0xff] }
 0x7d7   : > { %v1666_v57 = vpop.f32.mrf.mxu2 }
 0x7d9   : > { %v1740_v59 = vpop.f32.mrf.mxu1 }
 0x845   : > { %v1592_v60 = vpop.f32.mrf.mxu3 }
 0x846   : > { %v1609_v62 = vadd.f32 %v3526_v41, %v1592_v60 }
 0x84d   : > { %v1594_v61 = vpop.f32.mrf.mxu3 }
 0x855   : > { %v1681_v45 = vpop.f32.mrf.mxu3 }
 0x856   : > { %v1685_v63 = vadd.f32 %v1681_v45, %v1609_v62 }
 0x857   : > { %v1755_v1 = vpop.f32.mrf.mxu2 }
 0x858   : > { %v1759_v2 = vadd.f32 %v1755_v1, %v1685_v63 }
 0x85a   : > { %v1765_v54 = vadd.f32 %v3545_v16, %v1759_v2  ;;  %v1795_v16 = vmul.f32 %v1791_v15, %v3557_v37 }
 0x85c   : > { %v1767_v3 = vadd.f32 %v1765_v54, %v3393_v7  ;;  %v1797_v17 = vadd.f32 1e-05, %v1795_v16  ;;  %v2440_v7 = vld [vmem:[%s3787_s24 + $0x8] sm:$0xff] }
 0x85d   : > { %v1683_v4 = vpop.f32.mrf.mxu3  ;;  %1861 = vmatpush.bf16.msra.mxu3 %v2440_v7 }
 0x85e   : > { %v1773_v5 = vsel %vm1051_vm1, %v1767_v3, 0.0  ;;  %2630 = vrsqrt.f32 %v1797_v17  ;;  %vm1805_vm6 = vweird.f32 %v1797_v17 }
 0x85f   : > { %v1757_v8 = vpop.f32.mrf.mxu2  ;;  %1774 = vadd.xlane.f32.xlu0 %v1773_v5 }
 0x861   : > { %1862 = vmatpush.bf16.msra.mxu3 %v2439_v19 }
 0x864   : > { %v2631_v18 = vpop.eup %2630 }
 0x865   : > { %v1800_v20 = vmul.f32 %v2631_v18, %v1797_v17  ;;  %vm1806_vm5 = vweird.f32 %v2631_v18 }
 0x866   : > { %vm1807_vm7 = vmor %vm1805_vm6, %vm1806_vm5 }
 0x867   : > { %v1801_v51 = vmul.f32 %v2631_v18, %v1800_v20 }
 0x869   : > { %v1802_v22 = vmul.f32 0.5, %v1801_v51 }
 0x86b   : > { %v1803_v23 = vsub.f32 1.5, %v1802_v22 }
 0x86d   : > { %v1804_v25 = vmul.f32 %v2631_v18, %v1803_v23 }
 0x86f   : > { %v1808_v28 = vsel %vm1807_vm7, %v2631_v18, %v1804_v25 }
 0x870   : > { %v1819_v32 = vmul.f32 %v1808_v28, %v3560_v44  ;;  %v2441_v44 = vld [vmem:[%s3369_s19] sm:$0xff] }
 0x871   : > { %1919 = vmatpush.bf16.msrb.mxu0 %v2441_v44 }
 0x872   : > { %v1824_v14 = vmul.f32 %v2590_v6, %v1819_v32 }
 0x874   : > { %v1829_v36 = vadd.f32 %v2591_v31, %v1824_v14 }
 0x8d2   : > { %v1775_v9 = vpop.xlane.xlu0 %1774 }
 0x8d3   : > { %v1784_v10 = vmul.f32 %v3557_v37, %v1775_v9 }
 0x8d5   : > { %v1786_v11 = vsub.f32 %v1767_v3, %v1784_v10 }
 0x8d7   : > { %v1788_v41 = vmul.f32 %v1786_v11, %v1786_v11 }
 0x8d9   : > { %v1792_v12 = vsel %vm1051_vm1, %v1788_v41, 0.0 }
 0x8da   : > { %1793 = vadd.xlane.f32.xlu2 %v1792_v12 }
 0x94d   : > { %v1794_v0 = vpop.xlane.xlu2 %1793 }
 0x94e   : > { %v1796_v21 = vmul.f32 %v1794_v0, %v3557_v37 }
 0x950   : > { %v1798_v58 = vadd.f32 1e-05, %v1796_v21 }
 0x952   : > { %2632 = vrsqrt.f32 %v1798_v58  ;;  %vm1815_vm9 = vweird.f32 %v1798_v58 }
 0x958   : > { %v2633_v24 = vpop.eup %2632 }
 0x959   : > { %v1810_v26 = vmul.f32 %v2633_v24, %v1798_v58  ;;  %vm1816_vm8 = vweird.f32 %v2633_v24 }
 0x95a   : > { %vm1817_vm10 = vmor %vm1815_vm9, %vm1816_vm8 }
 0x95b   : > { %v1811_v27 = vmul.f32 %v2633_v24, %v1810_v26  ;;  %v2595_v26 = vld [vmem:[%s847_s16] ss:$0 sm:$0xff]  ;;  %s1999_s16 = sshll.u32 %s3380_s25, 4  ;;  %s2000_s16 = int_to_ptr.vmem [resolvable:$true] %s1999_s16 }
 0x95d   : > { %v1812_v30 = vmul.f32 0.5, %v1811_v27 }
 0x95f   : > { %v1813_v13 = vsub.f32 1.5, %v1812_v30 }
 0x961   : > { %v1814_v33 = vmul.f32 %v2633_v24, %v1813_v13 }
 0x963   : > { %v1818_v34 = vsel %vm1817_vm10, %v2633_v24, %v1814_v33 }
 0x964   : > { %v1820_v29 = vmul.f32 %v1818_v34, %v1786_v11 }
 0x966   : > { %v1825_v35 = vmul.f32 %v2590_v6, %v1820_v29 }
 0x968   : > { %v1830_v39 = vadd.f32 %v2591_v31, %v1825_v35 }
 0x96a   : > { %v1831_v40 = vpack.c.bf16 %v1830_v39, %v1829_v36 }
 0x96c   : > { %2404 = vmatmul.msk.bf16.vlgmr.msra.gmra.mxu3 %vm1051_vm1, %v1831_v40 }
 0x9ef   : > { %v1864_v46 = vpop.f32.mrf.mxu3 }
 0x9f0   : > { %v1865_v48 = vadd.f32 %v2592_v47, %v1864_v46 }
 0x9f2   : > { %v1869_v52 = vmax.f32 %v1865_v48, 0.0 }
 0x9f7   : > { %v1866_v49 = vpop.f32.mrf.mxu3 }
 0x9f8   : > { %v1867_v50 = vadd.f32 %v2592_v47, %v1866_v49 }
 0x9fa   : > { %v1870_v53 = vmax.f32 %v1867_v50, 0.0 }
 0x9fc   : > { %v1871_v55 = vpack.c.bf16 %v1870_v53, %v1869_v52 }
 0x9fe   : > { %2421 = vmatmul.msk.bf16.vlgmr.msrb.gmra.mxu0 %vm1908_vm11, %v1871_v55 }
 0xa7b   : > { %v1921_v57 = vpop.f32.mrf.mxu0 }
 0xa7c   : > { %v1922_v59 = vadd.f32 %v2593_v56, %v1921_v57 }
 0xa7e   : > { %v1926_v60 = vadd.f32 %v1922_v59, %v1829_v36 }
 0xa80   : > { %v1930_v61 = vsel %vm1051_vm1, %v1926_v60, 0.0 }
 0xa81   : > { %1931 = vadd.xlane.f32.xlu1 %v1930_v61 }
 0xa83   : > { %v1923_v62 = vpop.f32.mrf.mxu0 }
 0xa84   : > { %v1924_v45 = vadd.f32 %v2593_v56, %v1923_v62 }
 0xa86   : > { %v1927_v63 = vadd.f32 %v1924_v45, %v1830_v39 }
 0xa88   : > { %v1933_v1 = vsel %vm1051_vm1, %v1927_v63, 0.0 }
 0xa89   : > { %1934 = vadd.xlane.f32.xlu1 %v1933_v1 }
 0xaf4   : > { %v1932_v2 = vpop.xlane.xlu1 %1931 }
 0xaf5   : > { %v1936_v54 = vmul.f32 %v1932_v2, %v3557_v37 }
 0xaf7   : > { %v1938_v3 = vsub.f32 %v1926_v60, %v1936_v54 }
 0xaf9   : > { %v1940_v4 = vmul.f32 %v1938_v3, %v1938_v3 }
 0xafb   : > { %v1942_v5 = vsel %vm1051_vm1, %v1940_v4, 0.0 }
 0xafc   : > { %1943 = vadd.xlane.f32.xlu1 %v1942_v5  ;;  %v1935_v8 = vpop.xlane.xlu1 %1934 }
 0xafd   : > { %v1937_v9 = vmul.f32 %v1935_v8, %v3557_v37 }
 0xaff   : > { %v1939_v10 = vsub.f32 %v1927_v63, %v1937_v9 }
 0xb01   : > { %v1941_v11 = vmul.f32 %v1939_v10, %v1939_v10 }
 0xb03   : > { %v1945_v41 = vsel %vm1051_vm1, %v1941_v11, 0.0 }
 0xb04   : > { %1946 = vadd.xlane.f32.xlu1 %v1945_v41 }
 0xb6f   : > { %v1944_v12 = vpop.xlane.xlu1 %1943 }
 0xb70   : > { %v1948_v15 = vmul.f32 %v1944_v12, %v3557_v37 }
 0xb72   : > { %v1950_v16 = vadd.f32 1e-05, %v1948_v15 }
 0xb74   : > { %2634 = vrsqrt.f32 %v1950_v16  ;;  %vm1958_vm13 = vweird.f32 %v1950_v16 }
 0xb77   : > { %v1947_v17 = vpop.xlane.xlu1 %1946 }
 0xb78   : > { %v1949_v7 = vmul.f32 %v1947_v17, %v3557_v37  ;;  %v2594_v37 = vld [vmem:[%s1011_s0] ss:$0 sm:$0xff]  ;;  %s3796_s0 = sld [smem:[#allocation53_spill]] }
 0xb7a   : > { %v2635_v18 = vpop.eup %2634  ;;  %v1951_v19 = vadd.f32 1e-05, %v1949_v7 }
 0xb7b   : > { %v1953_v20 = vmul.f32 %v2635_v18, %v1950_v16  ;;  %vm1959_vm12 = vweird.f32 %v2635_v18 }
 0xb7c   : > { %2636 = vrsqrt.f32 %v1951_v19  ;;  %vm1960_vm14 = vmor %vm1958_vm13, %vm1959_vm12  ;;  %vm1968_vm0 = vweird.f32 %v1951_v19 }
 0xb7d   : > { %v1954_v51 = vmul.f32 %v2635_v18, %v1953_v20 }
 0xb7e   : > { %s3797_s5 = smov %s3796_s0  ;;  %s1998_s11 = scalar_lea.hbm %s3796_s0, %s2445_s15 }
 0xb7f   : > { %v1955_v0 = vmul.f32 0.5, %v1954_v51  ;;  %s2001_s21 = sshll.u32 %s1998_s11, 4  ;;  %s2868_s6 = scalar_lea.hbm %s3797_s5, 32  ;;  %s2002_s21 = int_to_ptr.hbm [resolvable:$true] %s2001_s21 }
 0xb80   : > { %s2862_s18 = sshra.s32 %s2002_s21, 4  ;;  %s2863_s18 = int_to_ptr.hbm [resolvable:$true] %s2862_s18 }
 0xb81   : > { %v1956_v21 = vsub.f32 1.5, %v1955_v0  ;;  %s2864_s26 = scalar_lea.hbm %s2863_s18, 16  ;;  %p2869_p0 = scmp.lt.s32.totalorder %s2863_s18, %s3797_s5 }
 0xb82   : > { %v2637_v58 = vpop.eup %2636  ;;  %p2865_p10 = scmp.ne.s32.totalorder %s2863_s18, %s2864_s26  ;;  %p2870_p1 = scmp.lt.s32.totalorder %s2868_s6, %s2864_s26 }
 0xb83   : > { %v1957_v22 = vmul.f32 %v2635_v18, %v1956_v21  ;;  %v1963_v23 = vmul.f32 %v2637_v58, %v1951_v19  ;;  %vm1969_vm15 = vweird.f32 %v2637_v58 }
 0xb84   : > { %vm1970_vm2 = vmor %vm1968_vm0, %vm1969_vm15  ;;  %p2866_p11 = pnand %p2865_p10, %p3179_p12  ;;  %p2871_p4 = por %p2870_p1, %p2869_p0 }
 0xb85   : > { %v1961_v24 = vsel %vm1960_vm14, %v2635_v18, %v1957_v22  ;;  %v1964_v25 = vmul.f32 %v2637_v58, %v1963_v23 }
 0xb86   : > { %v1972_v27 = vmul.f32 %v1961_v24, %v1938_v3  ;;  %p2867_p13 = pneg %p2866_p11 }
 0xb87   : > { %v1965_v28 = vmul.f32 0.5, %v1964_v25 }
 0xb88   : > { %v1977_v30 = vmul.f32 %v2594_v37, %v1972_v27  ;;  %p2872_p3 = pnand %p2871_p4, %p2867_p13 }
 0xb89   : > { %v1966_v13 = vsub.f32 1.5, %v1965_v28 }
 0xb8a   : > { %v1982_v6 = vadd.f32 %v2595_v26, %v1977_v30 }
 0xb8b   : > { %v1967_v32 = vmul.f32 %v2637_v58, %v1966_v13 }
 0xb8c   : > { %1984 = vst.msk [vmem:[%s3380_s25] sm:$0xff] %vm1051_vm1, %v1982_v6 }
 0xb8d   : > { %v1971_v33 = vsel %vm1970_vm2, %v2637_v58, %v1967_v32 }
 0xb8e   : > { %v1973_v34 = vmul.f32 %v1971_v33, %v1939_v10 }
 0xb90   : > { %v1978_v31 = vmul.f32 %v2594_v37, %v1973_v34 }
 0xb92   : > { %v1983_v14 = vadd.f32 %v2595_v26, %v1978_v31 }
 0xb94   : > { %1985 = vst.msk [vmem:[%s3380_s25 + $0x8] sm:$0xff] %vm1051_vm1, %v1983_v14 }
 0xb95   : > { %2875 = shalt.err (!%p2872_p3)
}
 0xb96   : > { %s2990_s25 = smov 128   ;;  %s2991_s20 = smov 8  }
 0xb97   : > { %2460 = dma.vmem_to_hbm [thread:$0]  (%p3179_p12), %s2000_s16, 256, %s2002_s21, %s1987_s17, %s2990_s25, %s2990_s25, %s2991_s20  }
 0xb98 PF: > { %s3800_s4 = sld [smem:[#allocation28_spill]] }
 0xb99   : > { %s3801_s13 = sld [smem:[#allocation20_spill]] }
 0xb9e   : > { %p2489_p5 = scmp.ge.s32.totalorder %s3800_s4, 2 }
 0xb9f   : > { %s2016_s22 = sand.u32 1, %s3801_s13  }
 0xba0   : > { %p2485_p6 = pnand %p2489_p5, %p3189_p2  ;;  %s2017_s8 = scalar_lea.sflag [#allocation4], %s2016_s22 }
 0xba2   : > { %p2486_p7 = pneg %p2485_p6 }
 0xba4   : > { %2937 = dma.done.wait (%p2486_p7), %s2017_s8, 256  }
 0xba5   : > { %2939 = vsyncadd (%p2486_p7), %s2017_s8, 4294967040  ;;  %s43_s2 = sadd.s32 1, %s3800_s4   ;;  %s3803_s27 = sld [smem:[#allocation21_spill]] }
 0xba6   : > { %p40_p9 = scmp.ge.s32.totalorder %s43_s2, 6   ;;  %s3804_s28 = sld [smem:[#allocation22_spill]] }
 0xba7   : > { %s3805_s29 = sld [smem:[#allocation32_spill]] }
 0xba8   : > { %s3806_s30 = sld [smem:[#allocation23_spill]] }
 0xba9   : > { %s3807_s0 = sld [smem:[#allocation24_spill]] }
 0xbaa   : > { %s3808_s19 = sld [smem:[#allocation31_spill]]  ;;  %42 = sbr.rel (!%p40_p9) target bundleno = 35 (0x23), region = 246 }
 0xbab   : > { %s3809_s1 = sld [smem:[#allocation26_spill]] }
 0xbac   : > { %s3810_s20 = sld [smem:[#allocation27_spill]] }
 0xbad   : > { %s3811_s21 = sld [smem:[#allocation29_spill]] }
 0xbae   : > { %s3812_s22 = sld [smem:[#allocation30_spill]] }
 0xbaf   :  { %2023 = vsyncpa [#allocation3], 1 }
 0xbb0   :  { %2025 = vsyncpa [#allocation3 + $0x1], 1 }
 0xbb1   :  { %2026 = vsyncpa [#allocation6], 1 }
 0xbb2   :  { %2028 = vsyncpa [#allocation6 + $0x1], 1 }
 0xbb3   :  { %2029 = vsyncpa [#allocation9], 1 }
 0xbb4   :  { %2031 = vsyncpa [#allocation9 + $0x1], 1 }
 0xbb5   :  { %2032 = vsyncpa [#allocation12], 1 }
 0xbb6   :  { %2034 = vsyncpa [#allocation12 + $0x1], 1 }
 0xbb7   :  { %2035 = vsyncpa [#allocation4], 1 }
 0xbb8   :  { %2037 = vsyncpa [#allocation4 + $0x1], 1 }

</bundles_post_ra>
